<compile_context>
chip_gen: v7x
topology: tpu7x:2x2x1
jax: 0.10.0
libtpu: 0.0.40
codegen_flags: <defaults>
</compile_context>

<pallas_src>
import functools
import numpy as np

import jax
import jax.numpy as jnp
from jax import lax
from jax.experimental import pallas as pl
from jax.experimental.pallas import tpu as pltpu

IN_DIM = 784
OUT_DIM = 10
LANES = 128                      # TPU lane width; output slabs padded to this

_C_LOG2PI = float(-0.5 * np.log(2.0 * np.pi))


# ----------------------------------------------------------------------------
# Small helpers
# ----------------------------------------------------------------------------
def _const_spec(shape):
    """Whole-array block, constant across the sample grid axis (fetched once)."""
    return pl.BlockSpec(tuple(shape), lambda s: (0,) * len(shape))


def _sample_spec(shape):
    """Per-sample block: leading MC-sample dim squeezed, trailing dims full."""
    return pl.BlockSpec((None,) + tuple(shape), lambda s: (s,) + (0,) * len(shape))


def _softplus(x):
    # stable softplus built from plain exp/log (keeps the Mosaic lowering simple)
    return jnp.maximum(x, 0.0) + jnp.log(1.0 + jnp.exp(-jnp.abs(x)))


def _softmax_rows(logits):
    m = jnp.max(logits, axis=-1, keepdims=True)
    e = jnp.exp(logits - m)
    # exact normalize: only B rows, and keeps rows summing to 1 to f32 precision
    return e / jnp.sum(e, axis=-1, keepdims=True)


def _store_lane_dense(out_ref, probs):
    # out_ref is a lane-dense (B, 128) VMEM tile; the HBM writeback is a
    # full-width DMA regardless of how the first OUT_DIM lanes were filled.
    out_ref[...] = jnp.zeros(out_ref.shape, out_ref.dtype)
    out_ref[:, :OUT_DIM] = probs


# ----------------------------------------------------------------------------
# Kernel 1 (training): fused sampling + KL + forward, grid over MC samples
# ----------------------------------------------------------------------------
def _bnn_train_kernel(x_ref,
                      w1_mu, w1_rho, b1_mu, b1_rho,
                      w2_mu, w2_rho, b2_mu, b2_rho,
                      w3_mu, w3_rho, b3_mu, b3_rho,
                      e_w1, e_b1, e_w2, e_b2, e_w3, e_b3,
                      out_ref, kl_ref,
                      *, stddev_prior):
    sp = float(stddev_prior)
    log_sp = float(np.log(sp))
    half_sp2 = float(0.5 * sp * sp)
    half_inv_var_p = float(0.5 / (sp * sp))

    def sample_and_kl(mu_ref, rho_ref, eps_ref):
        mu = mu_ref[...]
        rho = rho_ref[...]
        eps = eps_ref[...]
        s = _softplus(rho)                          # softplus(rho)
        w = mu + s * (sp * eps)                     # noise ~ N(0, stddev_prior)
        n = float(np.prod(mu.shape))
        # log q(w | mu, rho): (w - mu)^2 / s^2 == (sp * eps)^2  -> no reciprocal
        q = n * _C_LOG2PI - jnp.sum(s + half_sp2 * (eps * eps))
        # log p(w): prior mu = 0, scalar sigma = sp -> constants fold at trace time
        p = n * (_C_LOG2PI - log_sp) - half_inv_var_p * jnp.sum(w * w)
        return w, q, p

    x = x_ref[...]

    # Layer 1 (weights stored transposed (H, 784): lane-dense elementwise work).
    w1, q1, p1 = sample_and_kl(w1_mu, w1_rho, e_w1)
    b1, qb1, pb1 = sample_and_kl(b1_mu, b1_rho, e_b1)
    h1 = jnp.maximum(
        lax.dot_general(x, w1, (((1,), (1,)), ((), ())),
                        preferred_element_type=jnp.float32) + b1, 0.0)

    # Layer 2 (interleaved: w1 is dead before the next big sample).
    w2, q2, p2 = sample_and_kl(w2_mu, w2_rho, e_w2)
    b2, qb2, pb2 = sample_and_kl(b2_mu, b2_rho, e_b2)
    h2 = jnp.maximum(
        jnp.dot(h1, w2, preferred_element_type=jnp.float32) + b2, 0.0)

    # Layer 3.
    w3, q3, p3 = sample_and_kl(w3_mu, w3_rho, e_w3)
    b3, qb3, pb3 = sample_and_kl(b3_mu, b3_rho, e_b3)
    logits = jnp.dot(h2, w3, preferred_element_type=jnp.float32) + b3

    _store_lane_dense(out_ref, _softmax_rows(logits))

    # Per-tensor scalar sums are kept (12 small reductions): the kernel is
    # dispatch-bound at this size and the XLU is nowhere near saturated.
    q_w = q1 + qb1 + q2 + qb2 + q3 + qb3
    p_w = p1 + pb1 + p2 + pb2 + p3 + pb3
    lane = lax.broadcasted_iota(jnp.int32, (1, LANES), 1)
    kl_ref[...] = jnp.where(lane == 0, q_w, jnp.where(lane == 1, p_w, 0.0))


def _eps_shapes(params):
    return (params[0]["w_mu"].shape, params[0]["b_mu"].shape,
            params[1]["w_mu"].shape, params[1]["b_mu"].shape,
            params[2]["w_mu"].shape, params[2]["b_mu"].shape)


def _sample_eps(key, params, nb_samples):
    keys = jax.random.split(key, 6)
    return tuple(jax.random.normal(k, (nb_samples,) + tuple(s), jnp.float32)
                 for k, s in zip(keys, _eps_shapes(params)))


@functools.partial(jax.jit, static_argnames=("stddev_prior", "nb_samples"))
def bnn_forward_train_pallas(key, x, params, stddev_prior, nb_samples=1):
    """Returns (probs (S,B,10), q_w (S,), p_w (S,)) for S Monte-Carlo samples."""
    B = x.shape[0]
    S = int(nb_samples)
    eps = _sample_eps(key, params, S)
    p1, p2, p3 = params[0], params[1], params[2]
    const_ops = (x,
                 p1["w_mu"], p1["w_rho"], p1["b_mu"], p1["b_rho"],
                 p2["w_mu"], p2["w_rho"], p2["b_mu"], p2["b_rho"],
                 p3["w_mu"], p3["w_rho"], p3["b_mu"], p3["b_rho"])
    in_specs = ([_const_spec(a.shape) for a in const_ops]
                + [_sample_spec(e.shape[1:]) for e in eps])
    out_specs = [
        pl.BlockSpec((None, B, LANES), lambda s: (s, 0, 0)),
        pl.BlockSpec((None, 1, LANES), lambda s: (s, 0, 0)),
    ]
    probs_pad, kl_rows = pl.pallas_call(
        functools.partial(_bnn_train_kernel, stddev_prior=float(stddev_prior)),
        grid=(S,),
        in_specs=in_specs,
        out_specs=out_specs,
        out_shape=(jax.ShapeDtypeStruct((S, B, LANES), jnp.float32),
                   jax.ShapeDtypeStruct((S, 1, LANES), jnp.float32)),
        compiler_params=pltpu.CompilerParams(
            dimension_semantics=("parallel",)),   # v7x: MC samples across both TCs
    )(*const_ops, *eps)
    # Slices live inside the same jit -> no extra tiny dispatches around the kernel.
    return probs_pad[:, :, :OUT_DIM], kl_rows[:, 0, 0], kl_rows[:, 0, 1]


# ----------------------------------------------------------------------------
# Kernel 2 (test mode): deterministic forward with the mean weights
# ----------------------------------------------------------------------------
def _bnn_test_kernel(x_ref, w1_ref, b1_ref, w2_ref, b2_ref, w3_ref, b3_ref,
                     out_ref):
    x = x_ref[...]
    h1 = jnp.maximum(
        lax.dot_general(x, w1_ref[...], (((1,), (1,)), ((), ())),
                        preferred_element_type=jnp.float32) + b1_ref[...], 0.0)
    h2 = jnp.maximum(
        jnp.dot(h1, w2_ref[...], preferred_element_type=jnp.float32)
        + b2_ref[...], 0.0)
    logits = (jnp.dot(h2, w3_ref[...], preferred_element_type=jnp.float32)
              + b3_ref[...])
    _store_lane_dense(out_ref, _softmax_rows(logits))


@jax.jit
def bnn_forward_test_pallas(x, params):
    B = x.shape[0]
    ops = (x,
           params[0]["w_mu"], params[0]["b_mu"],
           params[1]["w_mu"], params[1]["b_mu"],
           params[2]["w_mu"], params[2]["b_mu"])
    probs_pad = pl.pallas_call(
        _bnn_test_kernel,
        grid=(1,),
        in_specs=[_const_spec(a.shape) for a in ops],
        out_specs=pl.BlockSpec((B, LANES), lambda s: (0, 0)),
        out_shape=jax.ShapeDtypeStruct((B, LANES), jnp.float32),
    )(*ops)
    return probs_pad[:, :OUT_DIM]


# ----------------------------------------------------------------------------
# Parameter setup + top-level forward (plain-JAX glue)
# ----------------------------------------------------------------------------
def init_gaussian_linear(key, in_dim, out_dim, stddev_prior, transpose=False):
    k1, k2, k3, k4 = jax.random.split(key, 4)
    w_shape = (out_dim, in_dim) if transpose else (in_dim, out_dim)
    return dict(
        w_mu=stddev_prior * jax.random.normal(k1, w_shape, jnp.float32),
        w_rho=stddev_prior * jax.random.normal(k2, w_shape, jnp.float32),
        # biases kept as (1, out_dim) rows -> no reshape in the hot path
        b_mu=stddev_prior * jax.random.normal(k3, (1, out_dim), jnp.float32),
        b_rho=stddev_prior * jax.random.normal(k4, (1, out_dim), jnp.float32),
    )


def bnn_gaussian_forward(key, x, params, stddev_prior, test=False):
    """Forward pass of BNN_Gaussian. Returns (softmax probs (B,10), q_w, p_w)."""
    if test:
        return bnn_forward_test_pallas(x, params), jnp.float32(0.0), jnp.float32(0.0)
    probs, q_w, p_w = bnn_forward_train_pallas(key, x, params, stddev_prior,
                                               nb_samples=1)
    return probs[0], q_w[0], p_w[0]


@functools.partial(jax.jit, static_argnames=("stddev_prior", "nb_samples"))
def bnn_forward_samples(key, x, y, params, stddev_prior, nb_samples=3):
    """Monte-Carlo ELBO terms; all samples run in ONE fused pallas_call."""
    probs, q_w, p_w = bnn_forward_train_pallas(key, x, params, stddev_prior,
                                               nb_samples)
    sp = float(stddev_prior)
    y_onehot = jax.nn.one_hot(y, OUT_DIM, dtype=jnp.float32)          # (B, 10)
    c = _C_LOG2PI - float(np.log(sp))
    ll = jnp.sum(c - 0.5 * (y_onehot[None] - probs) ** 2 / (sp * sp), axis=(1, 2))
    return jnp.mean(q_w), jnp.mean(p_w), jnp.mean(ll)


# ----------------------------------------------------------------------------
if __name__ == "__main__":
    hidden_size = 32
    stddev_prior = 0.1
    batch = 8

    root = jax.random.PRNGKey(0)
    k_x, k_p1, k_p2, k_p3, k_fwd, k_y = jax.random.split(root, 6)

    params = {
        0: init_gaussian_linear(k_p1, IN_DIM, hidden_size, stddev_prior,
                                transpose=True),    # layer-1 stored (H, 784)
        1: init_gaussian_linear(k_p2, hidden_size, hidden_size, stddev_prior),
        2: init_gaussian_linear(k_p3, hidden_size, OUT_DIM, stddev_prior),
    }
    x = jax.random.normal(k_x, (batch, IN_DIM), dtype=jnp.float32)
    y = jax.random.randint(k_y, (batch,), 0, OUT_DIM)

    # training-mode forward: one fused kernel (sampling + KL + MLP + softmax)
    probs, q_w, p_w = bnn_gaussian_forward(k_fwd, x, params, stddev_prior,
                                           test=False)
    probs, q_w, p_w = jax.block_until_ready((probs, q_w, p_w))

    # test-mode forward: deterministic forward on the mean weights
    probs_test, _, _ = bnn_gaussian_forward(k_fwd, x, params, stddev_prior,
                                            test=True)
    probs_test = jax.block_until_ready(probs_test)

    # multi-sample ELBO terms: grid=(3,) fused kernel, params fetched once
    mq, mp, mll = bnn_forward_samples(k_fwd, x, y, params, stddev_prior,
                                      nb_samples=3)
    mq, mp, mll = jax.block_until_ready((mq, mp, mll))

    # ---------------- pure-JAX references ----------------
    # deterministic (test) path
    h = jax.nn.relu(x @ params[0]["w_mu"].T + params[0]["b_mu"])
    h = jax.nn.relu(h @ params[1]["w_mu"] + params[1]["b_mu"])
    ref_test = jax.nn.softmax(h @ params[2]["w_mu"] + params[2]["b_mu"], axis=1)

    # stochastic (train) path, using the identical host-generated noise stream
    eps_ref = _sample_eps(k_fwd, params, 1)

    def ref_train():
        sp = stddev_prior
        c = _C_LOG2PI
        q_t, p_t, ws = 0.0, 0.0, []
        for li, (ew, eb) in enumerate(zip(eps_ref[0::2], eps_ref[1::2])):
            prm = params[li]
            s_w = jax.nn.softplus(prm["w_rho"])
            s_b = jax.nn.softplus(prm["b_rho"])
            w = prm["w_mu"] + s_w * (sp * ew[0])
            b = prm["b_mu"] + s_b * (sp * eb[0])
            q_t += jnp.sum(c - s_w - 0.5 * (w - prm["w_mu"]) ** 2 / s_w ** 2)
            q_t += jnp.sum(c - s_b - 0.5 * (b - prm["b_mu"]) ** 2 / s_b ** 2)
            p_t += jnp.sum(c - np.log(sp) - 0.5 * w ** 2 / sp ** 2)
            p_t += jnp.sum(c - np.log(sp) - 0.5 * b ** 2 / sp ** 2)
            ws.append((w, b))
        h1 = jax.nn.relu(x @ ws[0][0].T + ws[0][1])
        h2 = jax.nn.relu(h1 @ ws[1][0] + ws[1][1])
        pr = jax.nn.softmax(h2 @ ws[2][0] + ws[2][1], axis=1)
        return pr, q_t, p_t

    ref_probs, ref_q, ref_p = ref_train()

    # ---------------- checks ----------------
    assert probs.shape == (batch, OUT_DIM)
    assert probs_test.shape == (batch, OUT_DIM)
    np.testing.assert_allclose(np.asarray(jnp.sum(probs, axis=1)), 1.0, atol=1e-4)
    np.testing.assert_allclose(np.asarray(jnp.sum(probs_test, axis=1)), 1.0, atol=1e-4)
    np.testing.assert_allclose(np.asarray(probs_test), np.asarray(ref_test),
                               atol=2e-2)
    np.testing.assert_allclose(np.asarray(probs), np.asarray(ref_probs),
                               atol=2e-2)
    np.testing.assert_allclose(float(q_w), float(ref_q), rtol=5e-3)
    np.testing.assert_allclose(float(p_w), float(ref_p), rtol=5e-3)
    assert np.isfinite(float(mq)) and np.isfinite(float(mp)) and np.isfinite(float(mll))

    print("KERNEL_OK")
</pallas_src>

<mosaic_0001>
module attributes {stable_mosaic.version = 11 : i64} {
  func.func @_bnn_train_kernel(%arg0: i32, %arg1: memref<8x784xf32, #tpu.memory_space<vmem>>, %arg2: memref<32x784xf32, #tpu.memory_space<vmem>>, %arg3: memref<32x784xf32, #tpu.memory_space<vmem>>, %arg4: memref<1x32xf32, #tpu.memory_space<vmem>>, %arg5: memref<1x32xf32, #tpu.memory_space<vmem>>, %arg6: memref<32x32xf32, #tpu.memory_space<vmem>>, %arg7: memref<32x32xf32, #tpu.memory_space<vmem>>, %arg8: memref<1x32xf32, #tpu.memory_space<vmem>>, %arg9: memref<1x32xf32, #tpu.memory_space<vmem>>, %arg10: memref<32x10xf32, #tpu.memory_space<vmem>>, %arg11: memref<32x10xf32, #tpu.memory_space<vmem>>, %arg12: memref<1x10xf32, #tpu.memory_space<vmem>>, %arg13: memref<1x10xf32, #tpu.memory_space<vmem>>, %arg14: memref<1x32x784xf32, #tpu.memory_space<vmem>>, %arg15: memref<1x1x32xf32, #tpu.memory_space<vmem>>, %arg16: memref<1x32x32xf32, #tpu.memory_space<vmem>>, %arg17: memref<1x1x32xf32, #tpu.memory_space<vmem>>, %arg18: memref<1x32x10xf32, #tpu.memory_space<vmem>>, %arg19: memref<1x1x10xf32, #tpu.memory_space<vmem>>, %arg20: memref<1x8x128xf32, #tpu.memory_space<vmem>>, %arg21: memref<1x1x128xf32, #tpu.memory_space<vmem>>) attributes {dimension_semantics = [#tpu.dimension_semantics<parallel>], iteration_bounds = array<i64: 1>, scalar_prefetch = 0 : i64, scratch_operands = 0 : i64, tpu.core_type = #tpu.core_type<tc>, window_params = [{pipeline_mode = #tpu.pipeline_mode<synchronous>, transform_indices = @transform_0, window_bounds = array<i64: 8, 784>}, {pipeline_mode = #tpu.pipeline_mode<synchronous>, transform_indices = @transform_1, window_bounds = array<i64: 32, 784>}, {pipeline_mode = #tpu.pipeline_mode<synchronous>, transform_indices = @transform_2, window_bounds = array<i64: 32, 784>}, {pipeline_mode = #tpu.pipeline_mode<synchronous>, transform_indices = @transform_3, window_bounds = array<i64: 1, 32>}, {pipeline_mode = #tpu.pipeline_mode<synchronous>, transform_indices = @transform_4, window_bounds = array<i64: 1, 32>}, {pipeline_mode = #tpu.pipeline_mode<synchronous>, transform_indices = @transform_5, window_bounds = array<i64: 32, 32>}, {pipeline_mode = #tpu.pipeline_mode<synchronous>, transform_indices = @transform_6, window_bounds = array<i64: 32, 32>}, {pipeline_mode = #tpu.pipeline_mode<synchronous>, transform_indices = @transform_7, window_bounds = array<i64: 1, 32>}, {pipeline_mode = #tpu.pipeline_mode<synchronous>, transform_indices = @transform_8, window_bounds = array<i64: 1, 32>}, {pipeline_mode = #tpu.pipeline_mode<synchronous>, transform_indices = @transform_9, window_bounds = array<i64: 32, 10>}, {pipeline_mode = #tpu.pipeline_mode<synchronous>, transform_indices = @transform_10, window_bounds = array<i64: 32, 10>}, {pipeline_mode = #tpu.pipeline_mode<synchronous>, transform_indices = @transform_11, window_bounds = array<i64: 1, 10>}, {pipeline_mode = #tpu.pipeline_mode<synchronous>, transform_indices = @transform_12, window_bounds = array<i64: 1, 10>}, {transform_indices = @transform_13, window_bounds = array<i64: 1, 32, 784>}, {transform_indices = @transform_14, window_bounds = array<i64: 1, 1, 32>}, {transform_indices = @transform_15, window_bounds = array<i64: 1, 32, 32>}, {transform_indices = @transform_16, window_bounds = array<i64: 1, 1, 32>}, {transform_indices = @transform_17, window_bounds = array<i64: 1, 32, 10>}, {transform_indices = @transform_18, window_bounds = array<i64: 1, 1, 10>}, {transform_indices = @transform_19, window_bounds = array<i64: 1, 8, 128>}, {transform_indices = @transform_20, window_bounds = array<i64: 1, 1, 128>}]} {
    %c0 = arith.constant 0 : index
    %c0_0 = arith.constant 0 : index
    %0 = vector.load %arg1[%c0, %c0_0] : memref<8x784xf32, #tpu.memory_space<vmem>>, vector<8x784xf32>
    %c0_1 = arith.constant 0 : index
    %c0_2 = arith.constant 0 : index
    %1 = vector.load %arg2[%c0_1, %c0_2] : memref<32x784xf32, #tpu.memory_space<vmem>>, vector<32x784xf32>
    %c0_3 = arith.constant 0 : index
    %c0_4 = arith.constant 0 : index
    %2 = vector.load %arg3[%c0_3, %c0_4] : memref<32x784xf32, #tpu.memory_space<vmem>>, vector<32x784xf32>
    %c0_5 = arith.constant 0 : index
    %c0_6 = arith.constant 0 : index
    %c0_7 = arith.constant 0 : index
    %3 = vector.load %arg14[%c0_5, %c0_6, %c0_7] : memref<1x32x784xf32, #tpu.memory_space<vmem>>, vector<1x32x784xf32>
    %4 = vector.shape_cast %3 : vector<1x32x784xf32> to vector<32x784xf32>
    %cst = arith.constant 0.000000e+00 : f32
    %5 = vector.broadcast %cst : f32 to vector<32x784xf32>
    %6 = arith.maximumf %2, %5 : vector<32x784xf32>
    %7 = math.absf %2 : vector<32x784xf32>
    %cst_8 = arith.constant 0.000000e+00 : f32
    %8 = vector.broadcast %cst_8 : f32 to vector<32x784xf32>
    %9 = arith.subf %8, %7 : vector<32x784xf32>
    %10 = math.exp %9 : vector<32x784xf32>
    %cst_9 = arith.constant 1.000000e+00 : f32
    %11 = vector.broadcast %cst_9 : f32 to vector<32x784xf32>
    %12 = arith.addf %11, %10 : vector<32x784xf32>
    %13 = math.log %12 : vector<32x784xf32>
    %14 = arith.addf %6, %13 : vector<32x784xf32>
    %cst_10 = arith.constant 1.000000e-01 : f32
    %15 = vector.broadcast %cst_10 : f32 to vector<32x784xf32>
    %16 = arith.mulf %15, %4 : vector<32x784xf32>
    %17 = arith.mulf %14, %16 : vector<32x784xf32>
    %18 = arith.addf %1, %17 : vector<32x784xf32>
    %19 = arith.mulf %4, %4 : vector<32x784xf32>
    %cst_11 = arith.constant 5.000000e-03 : f32
    %20 = vector.broadcast %cst_11 : f32 to vector<32x784xf32>
    %21 = arith.mulf %20, %19 : vector<32x784xf32>
    %22 = arith.addf %14, %21 : vector<32x784xf32>
    %23 = vector.shape_cast %22 : vector<32x784xf32> to vector<1x32x784xf32>
    %cst_12 = arith.constant dense<0.000000e+00> : vector<1xf32>
    %24 = vector.multi_reduction <add>, %23, %cst_12 [1, 2] : vector<1x32x784xf32> to vector<1xf32>
    %25 = vector.shape_cast %24 : vector<1xf32> to vector<1x1x1xf32>
    %26 = vector.extract %25[0, 0, 0] : f32 from vector<1x1x1xf32>
    %cst_13 = arith.constant -23054.3301 : f32
    %27 = arith.subf %cst_13, %26 : f32
    %28 = arith.mulf %18, %18 : vector<32x784xf32>
    %29 = vector.shape_cast %28 : vector<32x784xf32> to vector<1x32x784xf32>
    %cst_14 = arith.constant dense<0.000000e+00> : vector<1xf32>
    %30 = vector.multi_reduction <add>, %29, %cst_14 [1, 2] : vector<1x32x784xf32> to vector<1xf32>
    %31 = vector.shape_cast %30 : vector<1xf32> to vector<1x1x1xf32>
    %32 = vector.extract %31[0, 0, 0] : f32 from vector<1x1x1xf32>
    %cst_15 = arith.constant 5.000000e+01 : f32
    %33 = arith.mulf %cst_15, %32 : f32
    %cst_16 = arith.constant 34712.9258 : f32
    %34 = arith.subf %cst_16, %33 : f32
    %c0_17 = arith.constant 0 : index
    %c0_18 = arith.constant 0 : index
    %35 = vector.load %arg4[%c0_17, %c0_18] : memref<1x32xf32, #tpu.memory_space<vmem>>, vector<1x32xf32>
    %c0_19 = arith.constant 0 : index
    %c0_20 = arith.constant 0 : index
    %36 = vector.load %arg5[%c0_19, %c0_20] : memref<1x32xf32, #tpu.memory_space<vmem>>, vector<1x32xf32>
    %c0_21 = arith.constant 0 : index
    %c0_22 = arith.constant 0 : index
    %c0_23 = arith.constant 0 : index
    %37 = vector.load %arg15[%c0_21, %c0_22, %c0_23] : memref<1x1x32xf32, #tpu.memory_space<vmem>>, vector<1x1x32xf32>
    %38 = vector.shape_cast %37 : vector<1x1x32xf32> to vector<1x32xf32>
    %cst_24 = arith.constant 0.000000e+00 : f32
    %39 = vector.broadcast %cst_24 : f32 to vector<1x32xf32>
    %40 = arith.maximumf %36, %39 : vector<1x32xf32>
    %41 = math.absf %36 : vector<1x32xf32>
    %cst_25 = arith.constant 0.000000e+00 : f32
    %42 = vector.broadcast %cst_25 : f32 to vector<1x32xf32>
    %43 = arith.subf %42, %41 : vector<1x32xf32>
    %44 = math.exp %43 : vector<1x32xf32>
    %cst_26 = arith.constant 1.000000e+00 : f32
    %45 = vector.broadcast %cst_26 : f32 to vector<1x32xf32>
    %46 = arith.addf %45, %44 : vector<1x32xf32>
    %47 = math.log %46 : vector<1x32xf32>
    %48 = arith.addf %40, %47 : vector<1x32xf32>
    %cst_27 = arith.constant 1.000000e-01 : f32
    %49 = vector.broadcast %cst_27 : f32 to vector<1x32xf32>
    %50 = arith.mulf %49, %38 : vector<1x32xf32>
    %51 = arith.mulf %48, %50 : vector<1x32xf32>
    %52 = arith.addf %35, %51 : vector<1x32xf32>
    %53 = arith.mulf %38, %38 : vector<1x32xf32>
    %cst_28 = arith.constant 5.000000e-03 : f32
    %54 = vector.broadcast %cst_28 : f32 to vector<1x32xf32>
    %55 = arith.mulf %54, %53 : vector<1x32xf32>
    %56 = arith.addf %48, %55 : vector<1x32xf32>
    %57 = vector.shape_cast %56 : vector<1x32xf32> to vector<1x1x32xf32>
    %cst_29 = arith.constant dense<0.000000e+00> : vector<1xf32>
    %58 = vector.multi_reduction <add>, %57, %cst_29 [1, 2] : vector<1x1x32xf32> to vector<1xf32>
    %59 = vector.shape_cast %58 : vector<1xf32> to vector<1x1x1xf32>
    %60 = vector.extract %59[0, 0, 0] : f32 from vector<1x1x1xf32>
    %cst_30 = arith.constant -29.4060326 : f32
    %61 = arith.subf %cst_30, %60 : f32
    %62 = arith.mulf %52, %52 : vector<1x32xf32>
    %63 = vector.shape_cast %62 : vector<1x32xf32> to vector<1x1x32xf32>
    %cst_31 = arith.constant dense<0.000000e+00> : vector<1xf32>
    %64 = vector.multi_reduction <add>, %63, %cst_31 [1, 2] : vector<1x1x32xf32> to vector<1xf32>
    %65 = vector.shape_cast %64 : vector<1xf32> to vector<1x1x1xf32>
    %66 = vector.extract %65[0, 0, 0] : f32 from vector<1x1x1xf32>
    %cst_32 = arith.constant 5.000000e+01 : f32
    %67 = arith.mulf %cst_32, %66 : f32
    %cst_33 = arith.constant 44.2766914 : f32
    %68 = arith.subf %cst_33, %67 : f32
    %cst_34 = arith.constant dense<0.000000e+00> : vector<8x32xf32>
    %69 = tpu.matmul %0, %18, %cst_34 {dimension_numbers = #tpu.dot_dimension_numbers<[1], [1], [0], [0], [0, 0, 1, 0], [], []>} : vector<8x784xf32>, vector<32x784xf32>, vector<8x32xf32> -> vector<8x32xf32>
    %70 = vector.broadcast %52 : vector<1x32xf32> to vector<8x32xf32>
    %71 = arith.addf %69, %70 : vector<8x32xf32>
    %cst_35 = arith.constant 0.000000e+00 : f32
    %72 = vector.broadcast %cst_35 : f32 to vector<8x32xf32>
    %73 = arith.maximumf %71, %72 : vector<8x32xf32>
    %c0_36 = arith.constant 0 : index
    %c0_37 = arith.constant 0 : index
    %74 = vector.load %arg6[%c0_36, %c0_37] : memref<32x32xf32, #tpu.memory_space<vmem>>, vector<32x32xf32>
    %c0_38 = arith.constant 0 : index
    %c0_39 = arith.constant 0 : index
    %75 = vector.load %arg7[%c0_38, %c0_39] : memref<32x32xf32, #tpu.memory_space<vmem>>, vector<32x32xf32>
    %c0_40 = arith.constant 0 : index
    %c0_41 = arith.constant 0 : index
    %c0_42 = arith.constant 0 : index
    %76 = vector.load %arg16[%c0_40, %c0_41, %c0_42] : memref<1x32x32xf32, #tpu.memory_space<vmem>>, vector<1x32x32xf32>
    %77 = vector.shape_cast %76 : vector<1x32x32xf32> to vector<32x32xf32>
    %cst_43 = arith.constant 0.000000e+00 : f32
    %78 = vector.broadcast %cst_43 : f32 to vector<32x32xf32>
    %79 = arith.maximumf %75, %78 : vector<32x32xf32>
    %80 = math.absf %75 : vector<32x32xf32>
    %cst_44 = arith.constant 0.000000e+00 : f32
    %81 = vector.broadcast %cst_44 : f32 to vector<32x32xf32>
    %82 = arith.subf %81, %80 : vector<32x32xf32>
    %83 = math.exp %82 : vector<32x32xf32>
    %cst_45 = arith.constant 1.000000e+00 : f32
    %84 = vector.broadcast %cst_45 : f32 to vector<32x32xf32>
    %85 = arith.addf %84, %83 : vector<32x32xf32>
    %86 = math.log %85 : vector<32x32xf32>
    %87 = arith.addf %79, %86 : vector<32x32xf32>
    %cst_46 = arith.constant 1.000000e-01 : f32
    %88 = vector.broadcast %cst_46 : f32 to vector<32x32xf32>
    %89 = arith.mulf %88, %77 : vector<32x32xf32>
    %90 = arith.mulf %87, %89 : vector<32x32xf32>
    %91 = arith.addf %74, %90 : vector<32x32xf32>
    %92 = arith.mulf %77, %77 : vector<32x32xf32>
    %cst_47 = arith.constant 5.000000e-03 : f32
    %93 = vector.broadcast %cst_47 : f32 to vector<32x32xf32>
    %94 = arith.mulf %93, %92 : vector<32x32xf32>
    %95 = arith.addf %87, %94 : vector<32x32xf32>
    %96 = vector.shape_cast %95 : vector<32x32xf32> to vector<1x32x32xf32>
    %cst_48 = arith.constant dense<0.000000e+00> : vector<1xf32>
    %97 = vector.multi_reduction <add>, %96, %cst_48 [1, 2] : vector<1x32x32xf32> to vector<1xf32>
    %98 = vector.shape_cast %97 : vector<1xf32> to vector<1x1x1xf32>
    %99 = vector.extract %98[0, 0, 0] : f32 from vector<1x1x1xf32>
    %cst_49 = arith.constant -940.993041 : f32
    %100 = arith.subf %cst_49, %99 : f32
    %101 = arith.mulf %91, %91 : vector<32x32xf32>
    %102 = vector.shape_cast %101 : vector<32x32xf32> to vector<1x32x32xf32>
    %cst_50 = arith.constant dense<0.000000e+00> : vector<1xf32>
    %103 = vector.multi_reduction <add>, %102, %cst_50 [1, 2] : vector<1x32x32xf32> to vector<1xf32>
    %104 = vector.shape_cast %103 : vector<1xf32> to vector<1x1x1xf32>
    %105 = vector.extract %104[0, 0, 0] : f32 from vector<1x1x1xf32>
    %cst_51 = arith.constant 5.000000e+01 : f32
    %106 = arith.mulf %cst_51, %105 : f32
    %cst_52 = arith.constant 1416.85413 : f32
    %107 = arith.subf %cst_52, %106 : f32
    %c0_53 = arith.constant 0 : index
    %c0_54 = arith.constant 0 : index
    %108 = vector.load %arg8[%c0_53, %c0_54] : memref<1x32xf32, #tpu.memory_space<vmem>>, vector<1x32xf32>
    %c0_55 = arith.constant 0 : index
    %c0_56 = arith.constant 0 : index
    %109 = vector.load %arg9[%c0_55, %c0_56] : memref<1x32xf32, #tpu.memory_space<vmem>>, vector<1x32xf32>
    %c0_57 = arith.constant 0 : index
    %c0_58 = arith.constant 0 : index
    %c0_59 = arith.constant 0 : index
    %110 = vector.load %arg17[%c0_57, %c0_58, %c0_59] : memref<1x1x32xf32, #tpu.memory_space<vmem>>, vector<1x1x32xf32>
    %111 = vector.shape_cast %110 : vector<1x1x32xf32> to vector<1x32xf32>
    %cst_60 = arith.constant 0.000000e+00 : f32
    %112 = vector.broadcast %cst_60 : f32 to vector<1x32xf32>
    %113 = arith.maximumf %109, %112 : vector<1x32xf32>
    %114 = math.absf %109 : vector<1x32xf32>
    %cst_61 = arith.constant 0.000000e+00 : f32
    %115 = vector.broadcast %cst_61 : f32 to vector<1x32xf32>
    %116 = arith.subf %115, %114 : vector<1x32xf32>
    %117 = math.exp %116 : vector<1x32xf32>
    %cst_62 = arith.constant 1.000000e+00 : f32
    %118 = vector.broadcast %cst_62 : f32 to vector<1x32xf32>
    %119 = arith.addf %118, %117 : vector<1x32xf32>
    %120 = math.log %119 : vector<1x32xf32>
    %121 = arith.addf %113, %120 : vector<1x32xf32>
    %cst_63 = arith.constant 1.000000e-01 : f32
    %122 = vector.broadcast %cst_63 : f32 to vector<1x32xf32>
    %123 = arith.mulf %122, %111 : vector<1x32xf32>
    %124 = arith.mulf %121, %123 : vector<1x32xf32>
    %125 = arith.addf %108, %124 : vector<1x32xf32>
    %126 = arith.mulf %111, %111 : vector<1x32xf32>
    %cst_64 = arith.constant 5.000000e-03 : f32
    %127 = vector.broadcast %cst_64 : f32 to vector<1x32xf32>
    %128 = arith.mulf %127, %126 : vector<1x32xf32>
    %129 = arith.addf %121, %128 : vector<1x32xf32>
    %130 = vector.shape_cast %129 : vector<1x32xf32> to vector<1x1x32xf32>
    %cst_65 = arith.constant dense<0.000000e+00> : vector<1xf32>
    %131 = vector.multi_reduction <add>, %130, %cst_65 [1, 2] : vector<1x1x32xf32> to vector<1xf32>
    %132 = vector.shape_cast %131 : vector<1xf32> to vector<1x1x1xf32>
    %133 = vector.extract %132[0, 0, 0] : f32 from vector<1x1x1xf32>
    %cst_66 = arith.constant -29.4060326 : f32
    %134 = arith.subf %cst_66, %133 : f32
    %135 = arith.mulf %125, %125 : vector<1x32xf32>
    %136 = vector.shape_cast %135 : vector<1x32xf32> to vector<1x1x32xf32>
    %cst_67 = arith.constant dense<0.000000e+00> : vector<1xf32>
    %137 = vector.multi_reduction <add>, %136, %cst_67 [1, 2] : vector<1x1x32xf32> to vector<1xf32>
    %138 = vector.shape_cast %137 : vector<1xf32> to vector<1x1x1xf32>
    %139 = vector.extract %138[0, 0, 0] : f32 from vector<1x1x1xf32>
    %cst_68 = arith.constant 5.000000e+01 : f32
    %140 = arith.mulf %cst_68, %139 : f32
    %cst_69 = arith.constant 44.2766914 : f32
    %141 = arith.subf %cst_69, %140 : f32
    %cst_70 = arith.constant dense<0.000000e+00> : vector<8x32xf32>
    %142 = tpu.matmul %73, %91, %cst_70 {dimension_numbers = #tpu.dot_dimension_numbers<[1], [0], [0], [1], [0, 0, 1, 1], [], []>} : vector<8x32xf32>, vector<32x32xf32>, vector<8x32xf32> -> vector<8x32xf32>
    %143 = vector.broadcast %125 : vector<1x32xf32> to vector<8x32xf32>
    %144 = arith.addf %142, %143 : vector<8x32xf32>
    %cst_71 = arith.constant 0.000000e+00 : f32
    %145 = vector.broadcast %cst_71 : f32 to vector<8x32xf32>
    %146 = arith.maximumf %144, %145 : vector<8x32xf32>
    %c0_72 = arith.constant 0 : index
    %c0_73 = arith.constant 0 : index
    %147 = vector.load %arg10[%c0_72, %c0_73] : memref<32x10xf32, #tpu.memory_space<vmem>>, vector<32x10xf32>
    %c0_74 = arith.constant 0 : index
    %c0_75 = arith.constant 0 : index
    %148 = vector.load %arg11[%c0_74, %c0_75] : memref<32x10xf32, #tpu.memory_space<vmem>>, vector<32x10xf32>
    %c0_76 = arith.constant 0 : index
    %c0_77 = arith.constant 0 : index
    %c0_78 = arith.constant 0 : index
    %149 = vector.load %arg18[%c0_76, %c0_77, %c0_78] : memref<1x32x10xf32, #tpu.memory_space<vmem>>, vector<1x32x10xf32>
    %150 = vector.shape_cast %149 : vector<1x32x10xf32> to vector<32x10xf32>
    %cst_79 = arith.constant 0.000000e+00 : f32
    %151 = vector.broadcast %cst_79 : f32 to vector<32x10xf32>
    %152 = arith.maximumf %148, %151 : vector<32x10xf32>
    %153 = math.absf %148 : vector<32x10xf32>
    %cst_80 = arith.constant 0.000000e+00 : f32
    %154 = vector.broadcast %cst_80 : f32 to vector<32x10xf32>
    %155 = arith.subf %154, %153 : vector<32x10xf32>
    %156 = math.exp %155 : vector<32x10xf32>
    %cst_81 = arith.constant 1.000000e+00 : f32
    %157 = vector.broadcast %cst_81 : f32 to vector<32x10xf32>
    %158 = arith.addf %157, %156 : vector<32x10xf32>
    %159 = math.log %158 : vector<32x10xf32>
    %160 = arith.addf %152, %159 : vector<32x10xf32>
    %cst_82 = arith.constant 1.000000e-01 : f32
    %161 = vector.broadcast %cst_82 : f32 to vector<32x10xf32>
    %162 = arith.mulf %161, %150 : vector<32x10xf32>
    %163 = arith.mulf %160, %162 : vector<32x10xf32>
    %164 = arith.addf %147, %163 : vector<32x10xf32>
    %165 = arith.mulf %150, %150 : vector<32x10xf32>
    %cst_83 = arith.constant 5.000000e-03 : f32
    %166 = vector.broadcast %cst_83 : f32 to vector<32x10xf32>
    %167 = arith.mulf %166, %165 : vector<32x10xf32>
    %168 = arith.addf %160, %167 : vector<32x10xf32>
    %169 = vector.shape_cast %168 : vector<32x10xf32> to vector<1x32x10xf32>
    %cst_84 = arith.constant dense<0.000000e+00> : vector<1xf32>
    %170 = vector.multi_reduction <add>, %169, %cst_84 [1, 2] : vector<1x32x10xf32> to vector<1xf32>
    %171 = vector.shape_cast %170 : vector<1xf32> to vector<1x1x1xf32>
    %172 = vector.extract %171[0, 0, 0] : f32 from vector<1x1x1xf32>
    %cst_85 = arith.constant -294.060333 : f32
    %173 = arith.subf %cst_85, %172 : f32
    %174 = arith.mulf %164, %164 : vector<32x10xf32>
    %175 = vector.shape_cast %174 : vector<32x10xf32> to vector<1x32x10xf32>
    %cst_86 = arith.constant dense<0.000000e+00> : vector<1xf32>
    %176 = vector.multi_reduction <add>, %175, %cst_86 [1, 2] : vector<1x32x10xf32> to vector<1xf32>
    %177 = vector.shape_cast %176 : vector<1xf32> to vector<1x1x1xf32>
    %178 = vector.extract %177[0, 0, 0] : f32 from vector<1x1x1xf32>
    %cst_87 = arith.constant 5.000000e+01 : f32
    %179 = arith.mulf %cst_87, %178 : f32
    %cst_88 = arith.constant 442.766907 : f32
    %180 = arith.subf %cst_88, %179 : f32
    %c0_89 = arith.constant 0 : index
    %c0_90 = arith.constant 0 : index
    %181 = vector.load %arg12[%c0_89, %c0_90] : memref<1x10xf32, #tpu.memory_space<vmem>>, vector<1x10xf32>
    %c0_91 = arith.constant 0 : index
    %c0_92 = arith.constant 0 : index
    %182 = vector.load %arg13[%c0_91, %c0_92] : memref<1x10xf32, #tpu.memory_space<vmem>>, vector<1x10xf32>
    %c0_93 = arith.constant 0 : index
    %c0_94 = arith.constant 0 : index
    %c0_95 = arith.constant 0 : index
    %183 = vector.load %arg19[%c0_93, %c0_94, %c0_95] : memref<1x1x10xf32, #tpu.memory_space<vmem>>, vector<1x1x10xf32>
    %184 = vector.shape_cast %183 : vector<1x1x10xf32> to vector<1x10xf32>
    %cst_96 = arith.constant 0.000000e+00 : f32
    %185 = vector.broadcast %cst_96 : f32 to vector<1x10xf32>
    %186 = arith.maximumf %182, %185 : vector<1x10xf32>
    %187 = math.absf %182 : vector<1x10xf32>
    %cst_97 = arith.constant 0.000000e+00 : f32
    %188 = vector.broadcast %cst_97 : f32 to vector<1x10xf32>
    %189 = arith.subf %188, %187 : vector<1x10xf32>
    %190 = math.exp %189 : vector<1x10xf32>
    %cst_98 = arith.constant 1.000000e+00 : f32
    %191 = vector.broadcast %cst_98 : f32 to vector<1x10xf32>
    %192 = arith.addf %191, %190 : vector<1x10xf32>
    %193 = math.log %192 : vector<1x10xf32>
    %194 = arith.addf %186, %193 : vector<1x10xf32>
    %cst_99 = arith.constant 1.000000e-01 : f32
    %195 = vector.broadcast %cst_99 : f32 to vector<1x10xf32>
    %196 = arith.mulf %195, %184 : vector<1x10xf32>
    %197 = arith.mulf %194, %196 : vector<1x10xf32>
    %198 = arith.addf %181, %197 : vector<1x10xf32>
    %199 = arith.mulf %184, %184 : vector<1x10xf32>
    %cst_100 = arith.constant 5.000000e-03 : f32
    %200 = vector.broadcast %cst_100 : f32 to vector<1x10xf32>
    %201 = arith.mulf %200, %199 : vector<1x10xf32>
    %202 = arith.addf %194, %201 : vector<1x10xf32>
    %203 = vector.shape_cast %202 : vector<1x10xf32> to vector<1x1x10xf32>
    %cst_101 = arith.constant dense<0.000000e+00> : vector<1xf32>
    %204 = vector.multi_reduction <add>, %203, %cst_101 [1, 2] : vector<1x1x10xf32> to vector<1xf32>
    %205 = vector.shape_cast %204 : vector<1xf32> to vector<1x1x1xf32>
    %206 = vector.extract %205[0, 0, 0] : f32 from vector<1x1x1xf32>
    %cst_102 = arith.constant -9.18938541 : f32
    %207 = arith.subf %cst_102, %206 : f32
    %208 = arith.mulf %198, %198 : vector<1x10xf32>
    %209 = vector.shape_cast %208 : vector<1x10xf32> to vector<1x1x10xf32>
    %cst_103 = arith.constant dense<0.000000e+00> : vector<1xf32>
    %210 = vector.multi_reduction <add>, %209, %cst_103 [1, 2] : vector<1x1x10xf32> to vector<1xf32>
    %211 = vector.shape_cast %210 : vector<1xf32> to vector<1x1x1xf32>
    %212 = vector.extract %211[0, 0, 0] : f32 from vector<1x1x1xf32>
    %cst_104 = arith.constant 5.000000e+01 : f32
    %213 = arith.mulf %cst_104, %212 : f32
    %cst_105 = arith.constant 13.8364658 : f32
    %214 = arith.subf %cst_105, %213 : f32
    %cst_106 = arith.constant dense<0.000000e+00> : vector<8x10xf32>
    %215 = tpu.matmul %146, %164, %cst_106 {dimension_numbers = #tpu.dot_dimension_numbers<[1], [0], [0], [1], [0, 0, 1, 1], [], []>} : vector<8x32xf32>, vector<32x10xf32>, vector<8x10xf32> -> vector<8x10xf32>
    %216 = vector.broadcast %198 : vector<1x10xf32> to vector<8x10xf32>
    %217 = arith.addf %215, %216 : vector<8x10xf32>
    %cst_107 = arith.constant dense<0xFF800000> : vector<8xf32>
    %218 = vector.multi_reduction <maximumf>, %217, %cst_107 [1] : vector<8x10xf32> to vector<8xf32>
    %219 = vector.shape_cast %218 : vector<8xf32> to vector<8x1xf32>
    %220 = vector.broadcast %219 : vector<8x1xf32> to vector<8x10xf32>
    %221 = arith.subf %217, %220 : vector<8x10xf32>
    %222 = math.exp %221 : vector<8x10xf32>
    %cst_108 = arith.constant dense<0.000000e+00> : vector<8xf32>
    %223 = vector.multi_reduction <add>, %222, %cst_108 [1] : vector<8x10xf32> to vector<8xf32>
    %224 = vector.shape_cast %223 : vector<8xf32> to vector<8x1xf32>
    %225 = vector.broadcast %224 : vector<8x1xf32> to vector<8x10xf32>
    %226 = arith.divf %222, %225 : vector<8x10xf32>
    %cst_109 = arith.constant 0.000000e+00 : f32
    %227 = vector.broadcast %cst_109 : f32 to vector<8x128xf32>
    %c0_110 = arith.constant 0 : index
    %c0_111 = arith.constant 0 : index
    %c0_112 = arith.constant 0 : index
    %228 = vector.load %arg20[%c0_110, %c0_111, %c0_112] : memref<1x8x128xf32, #tpu.memory_space<vmem>>, vector<1x8x128xf32>
    %229 = vector.shape_cast %228 : vector<1x8x128xf32> to vector<8x128xf32>
    %230 = vector.shape_cast %227 : vector<8x128xf32> to vector<1x8x128xf32>
    tpu.vector_store %arg20[%c0_110, %c0_111, %c0_112], %230 {strides = array<i32>} : memref<1x8x128xf32, #tpu.memory_space<vmem>>, vector<1x8x128xf32>,
    %c0_113 = arith.constant 0 : index
    %c0_114 = arith.constant 0 : index
    %c0_115 = arith.constant 0 : index
    %231 = vector.load %arg20[%c0_113, %c0_114, %c0_115] : memref<1x8x128xf32, #tpu.memory_space<vmem>>, vector<1x8x10xf32>
    %232 = vector.shape_cast %231 : vector<1x8x10xf32> to vector<8x10xf32>
    %233 = vector.shape_cast %226 : vector<8x10xf32> to vector<1x8x10xf32>
    tpu.vector_store %arg20[%c0_113, %c0_114, %c0_115], %233 {strides = array<i32>} : memref<1x8x128xf32, #tpu.memory_space<vmem>>, vector<1x8x10xf32>,
    %234 = arith.addf %27, %61 : f32
    %235 = arith.addf %234, %100 : f32
    %236 = arith.addf %235, %134 : f32
    %237 = arith.addf %236, %173 : f32
    %238 = arith.addf %237, %207 : f32
    %239 = arith.addf %34, %68 : f32
    %240 = arith.addf %239, %107 : f32
    %241 = arith.addf %240, %141 : f32
    %242 = arith.addf %241, %180 : f32
    %243 = arith.addf %242, %214 : f32
    %244 = tpu.iota {dimensions = array<i32: 1>} : vector<1x128xi32>
    %c0_i32 = arith.constant 0 : i32
    %245 = vector.broadcast %c0_i32 : i32 to vector<1x128xi32>
    %246 = arith.cmpi eq, %244, %245 : vector<1x128xi32>
    %c1_i32 = arith.constant 1 : i32
    %247 = vector.broadcast %c1_i32 : i32 to vector<1x128xi32>
    %248 = arith.cmpi eq, %244, %247 : vector<1x128xi32>
    %cst_116 = arith.constant 0.000000e+00 : f32
    %249 = vector.broadcast %243 : f32 to vector<1x128xf32>
    %250 = vector.broadcast %cst_116 : f32 to vector<1x128xf32>
    %251 = arith.select %248, %249, %250 : vector<1x128xi1>, vector<1x128xf32>
    %252 = vector.broadcast %238 : f32 to vector<1x128xf32>
    %253 = arith.select %246, %252, %251 : vector<1x128xi1>, vector<1x128xf32>
    %c0_117 = arith.constant 0 : index
    %c0_118 = arith.constant 0 : index
    %c0_119 = arith.constant 0 : index
    %254 = vector.load %arg21[%c0_117, %c0_118, %c0_119] : memref<1x1x128xf32, #tpu.memory_space<vmem>>, vector<1x1x128xf32>
    %255 = vector.shape_cast %254 : vector<1x1x128xf32> to vector<1x128xf32>
    %256 = vector.shape_cast %253 : vector<1x128xf32> to vector<1x1x128xf32>
    tpu.vector_store %arg21[%c0_117, %c0_118, %c0_119], %256 {strides = array<i32>} : memref<1x1x128xf32, #tpu.memory_space<vmem>>, vector<1x1x128xf32>,
    return
  }
  func.func @transform_0(%arg0: i32) -> (i32, i32) {
    %c0_i32 = arith.constant 0 : i32
    %c0_i32_0 = arith.constant 0 : i32
    %c0_i32_1 = arith.constant 0 : i32
    return %c0_i32, %c0_i32_0 : i32, i32
  }
  func.func @transform_1(%arg0: i32) -> (i32, i32) {
    %c0_i32 = arith.constant 0 : i32
    %c0_i32_0 = arith.constant 0 : i32
    %c0_i32_1 = arith.constant 0 : i32
    return %c0_i32, %c0_i32_0 : i32, i32
  }
  func.func @transform_2(%arg0: i32) -> (i32, i32) {
    %c0_i32 = arith.constant 0 : i32
    %c0_i32_0 = arith.constant 0 : i32
    %c0_i32_1 = arith.constant 0 : i32
    return %c0_i32, %c0_i32_0 : i32, i32
  }
  func.func @transform_3(%arg0: i32) -> (i32, i32) {
    %c0_i32 = arith.constant 0 : i32
    %c0_i32_0 = arith.constant 0 : i32
    %c0_i32_1 = arith.constant 0 : i32
    return %c0_i32, %c0_i32_0 : i32, i32
  }
  func.func @transform_4(%arg0: i32) -> (i32, i32) {
    %c0_i32 = arith.constant 0 : i32
    %c0_i32_0 = arith.constant 0 : i32
    %c0_i32_1 = arith.constant 0 : i32
    return %c0_i32, %c0_i32_0 : i32, i32
  }
  func.func @transform_5(%arg0: i32) -> (i32, i32) {
    %c0_i32 = arith.constant 0 : i32
    %c0_i32_0 = arith.constant 0 : i32
    %c0_i32_1 = arith.constant 0 : i32
    return %c0_i32, %c0_i32_0 : i32, i32
  }
  func.func @transform_6(%arg0: i32) -> (i32, i32) {
    %c0_i32 = arith.constant 0 : i32
    %c0_i32_0 = arith.constant 0 : i32
    %c0_i32_1 = arith.constant 0 : i32
    return %c0_i32, %c0_i32_0 : i32, i32
  }
  func.func @transform_7(%arg0: i32) -> (i32, i32) {
    %c0_i32 = arith.constant 0 : i32
    %c0_i32_0 = arith.constant 0 : i32
    %c0_i32_1 = arith.constant 0 : i32
    return %c0_i32, %c0_i32_0 : i32, i32
  }
  func.func @transform_8(%arg0: i32) -> (i32, i32) {
    %c0_i32 = arith.constant 0 : i32
    %c0_i32_0 = arith.constant 0 : i32
    %c0_i32_1 = arith.constant 0 : i32
    return %c0_i32, %c0_i32_0 : i32, i32
  }
  func.func @transform_9(%arg0: i32) -> (i32, i32) {
    %c0_i32 = arith.constant 0 : i32
    %c0_i32_0 = arith.constant 0 : i32
    %c0_i32_1 = arith.constant 0 : i32
    return %c0_i32, %c0_i32_0 : i32, i32
  }
  func.func @transform_10(%arg0: i32) -> (i32, i32) {
    %c0_i32 = arith.constant 0 : i32
    %c0_i32_0 = arith.constant 0 : i32
    %c0_i32_1 = arith.constant 0 : i32
    return %c0_i32, %c0_i32_0 : i32, i32
  }
  func.func @transform_11(%arg0: i32) -> (i32, i32) {
    %c0_i32 = arith.constant 0 : i32
    %c0_i32_0 = arith.constant 0 : i32
    %c0_i32_1 = arith.constant 0 : i32
    return %c0_i32, %c0_i32_0 : i32, i32
  }
  func.func @transform_12(%arg0: i32) -> (i32, i32) {
    %c0_i32 = arith.constant 0 : i32
    %c0_i32_0 = arith.constant 0 : i32
    %c0_i32_1 = arith.constant 0 : i32
    return %c0_i32, %c0_i32_0 : i32, i32
  }
  func.func @transform_13(%arg0: i32) -> (i32, i32, i32) {
    %c0_i32 = arith.constant 0 : i32
    %c0_i32_0 = arith.constant 0 : i32
    %c0_i32_1 = arith.constant 0 : i32
    return %arg0, %c0_i32, %c0_i32_0 : i32, i32, i32
  }
  func.func @transform_14(%arg0: i32) -> (i32, i32, i32) {
    %c0_i32 = arith.constant 0 : i32
    %c0_i32_0 = arith.constant 0 : i32
    %c0_i32_1 = arith.constant 0 : i32
    return %arg0, %c0_i32, %c0_i32_0 : i32, i32, i32
  }
  func.func @transform_15(%arg0: i32) -> (i32, i32, i32) {
    %c0_i32 = arith.constant 0 : i32
    %c0_i32_0 = arith.constant 0 : i32
    %c0_i32_1 = arith.constant 0 : i32
    return %arg0, %c0_i32, %c0_i32_0 : i32, i32, i32
  }
  func.func @transform_16(%arg0: i32) -> (i32, i32, i32) {
    %c0_i32 = arith.constant 0 : i32
    %c0_i32_0 = arith.constant 0 : i32
    %c0_i32_1 = arith.constant 0 : i32
    return %arg0, %c0_i32, %c0_i32_0 : i32, i32, i32
  }
  func.func @transform_17(%arg0: i32) -> (i32, i32, i32) {
    %c0_i32 = arith.constant 0 : i32
    %c0_i32_0 = arith.constant 0 : i32
    %c0_i32_1 = arith.constant 0 : i32
    return %arg0, %c0_i32, %c0_i32_0 : i32, i32, i32
  }
  func.func @transform_18(%arg0: i32) -> (i32, i32, i32) {
    %c0_i32 = arith.constant 0 : i32
    %c0_i32_0 = arith.constant 0 : i32
    %c0_i32_1 = arith.constant 0 : i32
    return %arg0, %c0_i32, %c0_i32_0 : i32, i32, i32
  }
  func.func @transform_19(%arg0: i32) -> (i32, i32, i32) {
    %c0_i32 = arith.constant 0 : i32
    %c0_i32_0 = arith.constant 0 : i32
    %c0_i32_1 = arith.constant 0 : i32
    return %arg0, %c0_i32, %c0_i32_0 : i32, i32, i32
  }
  func.func @transform_20(%arg0: i32) -> (i32, i32, i32) {
    %c0_i32 = arith.constant 0 : i32
    %c0_i32_0 = arith.constant 0 : i32
    %c0_i32_1 = arith.constant 0 : i32
    return %arg0, %c0_i32, %c0_i32_0 : i32, i32, i32
  }
}

</mosaic_0001>

<bundles_post_ra>
// kernel: bnn_forward_train_pallas.1
= control target key start
LH: loop header
LB: loop body
LE: loop exit
PB: predicated region body
PF: predicated region fallthrough
CT: control target
= control target key end

     0   :  { %s2993_s0 = inlined_call_operand.vmem [shape: f32[8,784], index: 0, kind: input, shape index: {}]   ;;  %s2994_s1 = inlined_call_operand.vmem [shape: f32[32,784], index: 1, kind: input, shape index: {}]   ;;  %s2995_s2 = inlined_call_operand.vmem [shape: f32[32,784], index: 2, kind: input, shape index: {}]   ;;  %s2996_s3 = inlined_call_operand.vmem [shape: f32[1,32], index: 3, kind: input, shape index: {}]   ;;  %s2997_s4 = inlined_call_operand.vmem [shape: f32[1,32], index: 4, kind: input, shape index: {}]   ;;  %s2998_s5 = inlined_call_operand.vmem [shape: f32[32,32], index: 5, kind: input, shape index: {}]   ;;  %s2999_s6 = inlined_call_operand.vmem [shape: f32[32,32], index: 6, kind: input, shape index: {}]   ;;  %s3000_s7 = inlined_call_operand.vmem [shape: f32[1,32], index: 7, kind: input, shape index: {}]   ;;  %s3001_s8 = inlined_call_operand.vmem [shape: f32[1,32], index: 8, kind: input, shape index: {}]   ;;  %s3002_s9 = inlined_call_operand.vmem [shape: f32[32,10], index: 9, kind: input, shape index: {}]   ;;  %s3003_s10 = inlined_call_operand.vmem [shape: f32[32,10], index: 10, kind: input, shape index: {}]   ;;  %s3004_s11 = inlined_call_operand.vmem [shape: f32[1,10], index: 11, kind: input, shape index: {}]   ;;  %s3005_s12 = inlined_call_operand.vmem [shape: f32[1,10], index: 12, kind: input, shape index: {}]   ;;  %s3006_s13 = inlined_call_operand.vmem [shape: f32[1,32,784], index: 13, kind: input, shape index: {}]   ;;  %s3007_s14 = inlined_call_operand.vmem [shape: f32[1,1,32], index: 14, kind: input, shape index: {}]   ;;  %s3008_s15 = inlined_call_operand.vmem [shape: f32[1,32,32], index: 15, kind: input, shape index: {}]   ;;  %s3009_s16 = inlined_call_operand.vmem [shape: f32[1,1,32], index: 16, kind: input, shape index: {}]   ;;  %s3010_s17 = inlined_call_operand.vmem [shape: f32[1,32,10], index: 17, kind: input, shape index: {}]   ;;  %s3011_s18 = inlined_call_operand.vmem [shape: f32[1,1,10], index: 18, kind: input, shape index: {}]   ;;  %s3012_s19 = inlined_call_operand.hbm [shape: f32[1,8,128], index: 19, kind: output, shape index: {0}]   ;;  %s3013_s20 = inlined_call_operand.vmem [shape: f32[1,1,128], index: 20, kind: output, shape index: {1}]  }
   0x1   :  { %3030 = sst [smem:[#allocation18_spill]] %s2993_s0 }
   0x2   :  { %3031 = sst [smem:[#allocation19_spill]] %s2994_s1 }
   0x3   :  { %3032 = sst [smem:[#allocation20_spill]] %s2995_s2 }
   0x4   :  { %3033 = sst [smem:[#allocation21_spill]] %s2996_s3 }
   0x5   :  { %3034 = sst [smem:[#allocation22_spill]] %s2997_s4 }
   0x6   :  { %s3035_s23 = sld [smem:[#allocation20_spill]]  ;;  %v131_v25 = vld [vmem:[%s3006_s13 + $0x18] sm:$0xff]  ;;  %s3036_s26 = sld [smem:[#allocation18_spill]]  ;;  %v138_v29 = vld [vmem:[%s3006_s13 + $0x50] sm:$0xff]  ;;  %v3017_v45 = vmov 0.0   ;;  %v137_v50 = vld [vmem:[%s3006_s13 + $0x48] sm:$0xff] }
   0x7   :  { %v495_v30 = vmul.f32 %v131_v25, %v131_v25  ;;  %v2040_v36 = vmul.f32 0.1, %v131_v25  ;;  %v502_v37 = vmul.f32 %v138_v29, %v138_v29  ;;  %v2053_v43 = vmul.f32 0.1, %v138_v29  ;;  %1512 = vst [vmem:[#allocation2] sm:$0xff] %v3017_v45  ;;  %v130_v48 = vld [vmem:[%s3006_s13 + $0x10] sm:$0xff] }
   0x8   :  { %v494_v51 = vmul.f32 %v130_v48, %v130_v48  ;;  %v501_v58 = vmul.f32 %v137_v50, %v137_v50  ;;  %s3037_s4 = sld [smem:[#allocation19_spill]] }
   0x9   :  { %v2056_v47 = vmul.f32 0.005, %v495_v30  ;;  %v2066_v54 = vmul.f32 0.005, %v502_v37 }
   0xc   :  { %v1985_v0 = vld [vmem:[%s3035_s23 + $0x18] sm:$0xff]  ;;  %v1990_v1 = vld [vmem:[%s3035_s23 + $0x50] sm:$0xff]  ;;  %v2002_v6 = vld [vmem:[%s3035_s23 + $0x48] sm:$0xff] }
   0xd   :  { %v187_v2 = vand.u32 2147483647, %v1985_v0  ;;  %v194_v3 = vand.u32 2147483647, %v1990_v1  ;;  %v1997_v5 = vld [vmem:[%s3035_s23 + $0x10] sm:$0xff]  ;;  %v2009_v14 = vld [vmem:[%s3035_s23 + $0x88] sm:$0xff] }
   0xe   :  { %v186_v10 = vand.u32 2147483647, %v1997_v5  ;;  %v193_v11 = vand.u32 2147483647, %v2002_v6  ;;  %v2014_v15 = vld [vmem:[%s3035_s23 + $0xc0] sm:$0xff]  ;;  %v2026_v22 = vld [vmem:[%s3035_s23 + $0xb8] sm:$0xff] }
   0xf   :  { %v215_v4 = vsub.f32 0.0, %v187_v2  ;;  %v222_v7 = vsub.f32 0.0, %v194_v3  ;;  %v201_v16 = vand.u32 2147483647, %v2009_v14  ;;  %v208_v19 = vand.u32 2147483647, %v2014_v15 }
  0x10   :  { %v214_v12 = vsub.f32 0.0, %v186_v10  ;;  %v221_v13 = vsub.f32 0.0, %v193_v11  ;;  %v2021_v21 = vld [vmem:[%s3035_s23 + $0x80] sm:$0xff]  ;;  %v207_v27 = vand.u32 2147483647, %v2026_v22  ;;  %v68_v28 = vld [vmem:[%s3036_s26 + $0x18] sm:$0xff] }
  0x11   :  { %v246_v8 = vmul.f32 1.442695, %v215_v4  ;;  %v260_v9 = vmul.f32 1.442695, %v222_v7  ;;  %v229_v20 = vsub.f32 0.0, %v201_v16  ;;  %v236_v23 = vsub.f32 0.0, %v208_v19  ;;  %886 = vmatprep.mubr.f32.mxu0 %v68_v28 }
  0x12   :  { %v244_v17 = vmul.f32 1.442695, %v214_v12  ;;  %v258_v18 = vmul.f32 1.442695, %v221_v13  ;;  %v200_v26 = vand.u32 2147483647, %v2021_v21 }
  0x13   :  { %1684 = vpow2.f32 %v246_v8  ;;  %v274_v24 = vmul.f32 1.442695, %v229_v20  ;;  %v288_v31 = vmul.f32 1.442695, %v236_v23  ;;  %v159_v32 = vmax.f32 %v1985_v0, 0.0  ;;  %v2045_v38 = vld [vmem:[%s3035_s23 + $0x28] sm:$0xff] }
  0x14   :  { %1686 = vpow2.f32 %v260_v9  ;;  %v228_v33 = vsub.f32 0.0, %v200_v26  ;;  %v235_v34 = vsub.f32 0.0, %v207_v27  ;;  %v2050_v39 = vld [vmem:[%s3035_s23 + $0x60] sm:$0xff]  ;;  %v166_v41 = vmax.f32 %v1990_v1, 0.0  ;;  %v2078_v62 = vld [vmem:[%s3035_s23 + $0x58] sm:$0xff]  ;;  %v145_v7 = vld [vmem:[%s3006_s13 + $0x88] sm:$0xff] }
  0x15   :  { %1688 = vpow2.f32 %v244_v17  ;;  %v189_v52 = vand.u32 2147483647, %v2045_v38  ;;  %v196_v53 = vand.u32 2147483647, %v2050_v39  ;;  %v158_v55 = vmax.f32 %v1997_v5, 0.0  ;;  %v2073_v61 = vld [vmem:[%s3035_s23 + $0x20] sm:$0xff] }
  0x16   :  { %1690 = vpow2.f32 %v258_v18  ;;  %v272_v44 = vmul.f32 1.442695, %v228_v33  ;;  %v286_v49 = vmul.f32 1.442695, %v235_v34  ;;  %v165_v56 = vmax.f32 %v2002_v6, 0.0  ;;  %v152_v10 = vld [vmem:[%s3006_s13 + $0xc0] sm:$0xff] }
  0x17   :  { %1692 = vpow2.f32 %v274_v24  ;;  %v217_v59 = vsub.f32 0.0, %v189_v52  ;;  %v224_v60 = vsub.f32 0.0, %v196_v53  ;;  %v2080_v3 = vmul.f32 0.1, %v130_v48  ;;  %v2102_v28 = vld [vmem:[%s3035_s23 + $0x98] sm:$0xff]  ;;  %v2107_v29 = vld [vmem:[%s3035_s23 + $0xd0] sm:$0xff] }
  0x18   :  { %1694 = vpow2.f32 %v288_v31  ;;  %v2082_v4 = vmul.f32 0.1, %v137_v50  ;;  %v2087_v9 = vmul.f32 0.005, %v494_v51  ;;  %v509_v11 = vmul.f32 %v145_v7, %v145_v7  ;;  %v82_v0 = vld [vmem:[%s3037_s4 + $0x50] sm:$0xff] }
  0x19   :  { %v250_v12 = vmul.f32 1.442695, %v217_v59  ;;  %v264_v16 = vmul.f32 1.442695, %v224_v60  ;;  %v188_v17 = vand.u32 2147483647, %v2073_v61 }
  0x1a   :  { %v195_v18 = vand.u32 2147483647, %v2078_v62  ;;  %v2094_v19 = vmul.f32 0.005, %v501_v58  ;;  %v173_v20 = vmax.f32 %v2009_v14, 0.0  ;;  %v180_v34 = vmax.f32 %v2014_v15, 0.0 }
  0x1b   :  { %v2097_v25 = vmul.f32 0.1, %v145_v7  ;;  %v216_v26 = vsub.f32 0.0, %v188_v17  ;;  %v2109_v31 = vmul.f32 0.1, %v152_v10  ;;  %v179_v52 = vmax.f32 %v2026_v22, 0.0 }
  0x1c   :  { %v223_v27 = vsub.f32 0.0, %v195_v18  ;;  %v2111_v33 = vmul.f32 0.005, %v509_v11  ;;  %v203_v48 = vand.u32 2147483647, %v2102_v28  ;;  %v75_v11 = vld [vmem:[%s3037_s4 + $0x18] sm:$0xff] }
  0x1d   :  { %v1685_v35 = vpop.eup %1684  ;;  %v248_v37 = vmul.f32 1.442695, %v216_v26  ;;  %v96_v14 = vld [vmem:[%s3037_s4 + $0xc0] sm:$0xff] }
  0x1e   :  { %v1687_v40 = vpop.eup %1686  ;;  %v299_v42 = vadd.f32 1.0, %v1685_v35  ;;  %v144_v35 = vld [vmem:[%s3006_s13 + $0x80] sm:$0xff]  ;;  %v231_v59 = vsub.f32 0.0, %v203_v48 }
  0x1f   :  { %v306_v46 = vadd.f32 1.0, %v1687_v40  ;;  %v1689_v57 = vpop.eup %1688  ;;  %v262_v40 = vmul.f32 1.442695, %v223_v27  ;;  %v508_v53 = vmul.f32 %v144_v35, %v144_v35  ;;  %v132_v22 = vld [vmem:[%s3006_s13 + $0x20] sm:$0xff] }
  0x20   :  { %1696 = vlog2.f32 %v299_v42  ;;  %v1691_v63 = vpop.eup %1690  ;;  %v298_v2 = vadd.f32 1.0, %v1689_v57 }
  0x21   :  { %1698 = vlog2.f32 %v306_v46  ;;  %v305_v8 = vadd.f32 1.0, %v1691_v63  ;;  %v1693_v13 = vpop.eup %1692  ;;  %v172_v46 = vmax.f32 %v2021_v21, 0.0  ;;  %v2241_v21 = vld [vmem:[%s3035_s23 + $0x8] sm:$0xff] }
  0x22   :  { %1700 = vpow2.f32 %v272_v44  ;;  %v313_v23 = vadd.f32 1.0, %v1693_v13  ;;  %v1695_v24 = vpop.eup %1694  ;;  %v151_v44 = vld [vmem:[%s3006_s13 + $0xb8] sm:$0xff] }
  0x23   :  { %1702 = vpow2.f32 %v286_v49  ;;  %v320_v30 = vadd.f32 1.0, %v1695_v24  ;;  %v210_v49 = vand.u32 2147483647, %v2107_v29  ;;  %v2128_v10 = vmul.f32 0.1, %v151_v44 }
  0x24   :  { %1704 = vlog2.f32 %v298_v2  ;;  %v2142_v24 = vmul.f32 0.005, %v508_v53  ;;  %v161_v53 = vmax.f32 %v2045_v38, 0.0 }
  0x25   :  { %1706 = vlog2.f32 %v305_v8  ;;  %v238_v60 = vsub.f32 0.0, %v210_v49  ;;  %v2126_v8 = vmul.f32 0.1, %v144_v35  ;;  %v74_v49 = vld [vmem:[%s3037_s4 + $0x10] sm:$0xff] }
  0x26   :  { %1708 = vpow2.f32 %v250_v12 }
  0x27   :  { %1710 = vlog2.f32 %v313_v23  ;;  %v292_v17 = vmul.f32 1.442695, %v238_v60 }
  0x28   :  { %1712 = vpow2.f32 %v264_v16  ;;  %v278_v16 = vmul.f32 1.442695, %v231_v59 }
  0x29   :  { %1714 = vlog2.f32 %v320_v30  ;;  %v133_v30 = vld [vmem:[%s3006_s13 + $0x28] sm:$0xff] }
  0x2a   :  { %v1697_v42 = vpop.eup %1696  ;;  %1716 = vpow2.f32 %v248_v37  ;;  %v497_v37 = vmul.f32 %v133_v30, %v133_v30 }
  0x2b   :  { %v1699_v50 = vpop.eup %1698  ;;  %v331_v51 = vmul.f32 0.6931472, %v1697_v42  ;;  %1718 = vpow2.f32 %v262_v40  ;;  %v2156_v40 = vld [vmem:[%s3035_s23 + $0x90] sm:$0xff] }
  0x2c   :  { %v1701_v57 = vpop.eup %1700  ;;  %v345_v58 = vmul.f32 0.6931472, %v1699_v50  ;;  %v202_v6 = vand.u32 2147483647, %v2156_v40 }
  0x2d   :  { %v1703_v63 = vpop.eup %1702  ;;  %v383_v2 = vadd.f32 %v331_v51, %v159_v32  ;;  %v312_v7 = vadd.f32 1.0, %v1701_v57  ;;  %v168_v57 = vmax.f32 %v2050_v39, 0.0 }
  0x2e   :  { %v390_v12 = vadd.f32 %v345_v58, %v166_v41  ;;  %v319_v13 = vadd.f32 1.0, %v1703_v63  ;;  %v1705_v18 = vpop.eup %1704 }
  0x2f   :  { %v439_v32 = vmul.f32 %v2040_v36, %v383_v2  ;;  %v2140_v23 = vadd.f32 %v2056_v47, %v383_v2  ;;  %1720 = vlog2.f32 %v312_v7  ;;  %v1707_v26 = vpop.eup %1706  ;;  %v329_v27 = vmul.f32 0.6931472, %v1705_v18 }
  0x30   :  { %v446_v1 = vmul.f32 %v2053_v43, %v390_v12  ;;  %v2146_v41 = vadd.f32 %v2066_v54, %v390_v12  ;;  %1722 = vlog2.f32 %v319_v13  ;;  %v1709_v35 = vpop.eup %1708  ;;  %v343_v47 = vmul.f32 0.6931472, %v1707_v26  ;;  %v2188_v12 = vld [vmem:[%s3035_s23 + $0xc8] sm:$0xff] }
  0x31   :  { %v2151_v36 = vadd.f32 %v439_v32, %v75_v11  ;;  %1724 = vpow2.f32 %v278_v16  ;;  %v1711_v43 = vpop.eup %1710  ;;  %v382_v42 = vadd.f32 %v329_v27, %v158_v55  ;;  %v301_v44 = vadd.f32 1.0, %v1709_v35  ;;  %v81_v55 = vld [vmem:[%s3037_s4 + $0x48] sm:$0xff] }
  0x32   :  { %v2158_v54 = vadd.f32 %v446_v1, %v82_v0  ;;  %1726 = vpow2.f32 %v292_v17  ;;  %v1713_v48 = vpop.eup %1712  ;;  %v389_v50 = vadd.f32 %v343_v47, %v165_v56  ;;  %v359_v51 = vmul.f32 0.6931472, %v1711_v43  ;;  %v140_v0 = vld [vmem:[%s3006_s13 + $0x60] sm:$0xff] }
  0x33   :  { %v1715_v58 = vpop.eup %1714  ;;  %v438_v59 = vmul.f32 %v2080_v3, %v382_v42  ;;  %v2176_v60 = vadd.f32 %v2087_v9, %v382_v42  ;;  %v308_v13 = vadd.f32 1.0, %v1713_v48  ;;  %1728 = vlog2.f32 %v301_v44 }
  0x34   :  { %v1614_v5 = vpack.c.bf16 %v2158_v54, %v2151_v36  ;;  %v1717_v56 = vpop.eup %1716  ;;  %v445_v63 = vmul.f32 %v2082_v4, %v389_v50  ;;  %v2181_v2 = vadd.f32 %v2094_v19, %v389_v50  ;;  %v373_v7 = vmul.f32 0.6931472, %v1715_v58  ;;  %v89_v4 = vld [vmem:[%s3037_s4 + $0x88] sm:$0xff] }
  0x35   :  { %v397_v11 = vadd.f32 %v359_v51, %v173_v20  ;;  %v1719_v3 = vpop.eup %1718  ;;  %v2190_v9 = vadd.f32 %v438_v59, %v74_v49  ;;  %v300_v19 = vadd.f32 1.0, %v1717_v56  ;;  %1730 = vlog2.f32 %v308_v13 }
  0x36   :  { %1615 = vmatprep.subr.bf16.mxu0 %v1614_v5  ;;  %v2195_v16 = vadd.f32 %v445_v63, %v81_v55  ;;  %v2202_v20 = vadd.f32 %v373_v7, %v180_v34  ;;  %v2211_v32 = vmul.f32 0.1, %v133_v30  ;;  %v307_v26 = vadd.f32 1.0, %v1719_v3 }
  0x37   :  { %v453_v17 = vmul.f32 %v2097_v25, %v397_v11  ;;  %v2206_v18 = vadd.f32 %v2111_v33, %v397_v11  ;;  %v209_v1 = vand.u32 2147483647, %v2188_v12  ;;  %v504_v33 = vmul.f32 %v140_v0, %v140_v0 }
  0x38   :  { %3038 = vst [vmem:[#allocation5_spill] sm:$0xff] %v2202_v20  ;;  %v1616_v15 = vpack.c.bf16 %v2195_v16, %v2190_v9  ;;  %v460_v25 = vmul.f32 %v2109_v31, %v2202_v20  ;;  %1732 = vlog2.f32 %v300_v19  ;;  %v230_v43 = vsub.f32 0.0, %v202_v6  ;;  %v66_v31 = vld [vmem:[%s3036_s26 + $0x8] sm:$0xff]  ;;  %v88_v6 = vld [vmem:[%s3037_s4 + $0x80] sm:$0xff] }
  0x39   :  { %3039 = vst [vmem:[#allocation6_spill] sm:$0xff] %v2206_v18  ;;  %v1721_v27 = vpop.eup %1720  ;;  %v2218_v34 = vadd.f32 %v453_v17, %v89_v4  ;;  %v237_v42 = vsub.f32 0.0, %v209_v1  ;;  %v2222_v49 = vmul.f32 0.1, %v140_v0  ;;  %1734 = vlog2.f32 %v307_v26  ;;  %816 = vmatprep.mubr.f32.mxu1 %v66_v31  ;;  %v139_v4 = vld [vmem:[%s3006_s13 + $0x58] sm:$0xff] }
  0x3a   :  { %v1723_v35 = vpop.eup %1722  ;;  %v357_v47 = vmul.f32 0.6931472, %v1721_v27  ;;  %1617 = vmatpush1.bf16.xpose.msra.mxu0 %v1616_v15  ;;  %v2220_v44 = vadd.f32 %v460_v25, %v96_v14  ;;  %v525_v58 = vmul.f32 0.005, %v497_v37  ;;  %v276_v55 = vmul.f32 1.442695, %v230_v43 }
  0x3b   :  { %v1725_v30 = vpop.eup %1724  ;;  %v371_v48 = vmul.f32 0.6931472, %v1723_v35  ;;  %v290_v7 = vmul.f32 1.442695, %v237_v42  ;;  %v532_v3 = vmul.f32 0.005, %v504_v33 }
  0x3c   :  { %3040 = vst [vmem:[#allocation7_spill] sm:$0xff] %v2220_v44  ;;  %v1727_v50 = vpop.eup %1726  ;;  %v396_v51 = vadd.f32 %v357_v47, %v172_v46  ;;  %v315_v5 = vadd.f32 1.0, %v1725_v30  ;;  %v1618_v59 = vpack.c.bf16 %v2220_v44, %v2218_v34  ;;  %v95_v46 = vld [vmem:[%s3037_s4 + $0xb8] sm:$0xff]  ;;  %v160_v13 = vmax.f32 %v2073_v61, 0.0 }
  0x3d   :  { %v2236_v56 = vadd.f32 %v371_v48, %v179_v52  ;;  %v322_v63 = vadd.f32 1.0, %v1727_v50 }
  0x3e   :  { %v452_v37 = vmul.f32 %v2126_v8, %v396_v51  ;;  %v2248_v11 = vadd.f32 %v2142_v24, %v396_v51  ;;  %1736 = vlog2.f32 %v315_v5  ;;  %1619 = vmatprep.subr.bf16.mxu0 %v1618_v59  ;;  %v496_v8 = vmul.f32 %v132_v22, %v132_v22  ;;  %v2262_v24 = vld [vmem:[%s3035_s23 + $0x40] sm:$0xff] }
  0x3f   :  { %3041 = vst [vmem:[#allocation8_spill] sm:$0xff] %v2236_v56  ;;  %v459_v52 = vmul.f32 %v2128_v10, %v2236_v56  ;;  %1738 = vlog2.f32 %v322_v63 }
  0x40   :  { %26 = vsyncpa [#allocation3], 0  ;;  %v1729_v19 = vpop.eup %1728  ;;  %v2264_v14 = vadd.f32 %v452_v37, %v88_v6  ;;  %v503_v17 = vmul.f32 %v139_v4, %v139_v4  ;;  %1740 = vpow2.f32 %v276_v55  ;;  %v185_v10 = vand.u32 2147483647, %v2241_v21  ;;  %v77_v47 = vld [vmem:[%s3037_s4 + $0x28] sm:$0xff]  ;;  %v147_v38 = vld [vmem:[%s3006_s13 + $0x98] sm:$0xff] }
  0x41   :  { %v2267_v0 = vadd.f32 %v459_v52, %v95_v46  ;;  %v335_v26 = vmul.f32 0.6931472, %v1729_v19  ;;  %v412_v1 = vmul.f32 0.1, %v132_v22  ;;  %1742 = vpow2.f32 %v290_v7  ;;  %v1731_v61 = vpop.eup %1730  ;;  %v154_v7 = vld [vmem:[%s3006_s13 + $0xd0] sm:$0xff]  ;;  %v76_v52 = vld [vmem:[%s3037_s4 + $0x20] sm:$0xff] }
  0x42   :  { %v167_v27 = vmax.f32 %v2078_v62, 0.0  ;;  %v419_v15 = vmul.f32 0.1, %v139_v4  ;;  %v192_v25 = vand.u32 2147483647, %v2262_v24  ;;  %v213_v33 = vsub.f32 0.0, %v185_v10  ;;  %v1733_v48 = vpop.eup %1732 }
  0x43   :  { %3042 = vst [vmem:[#allocation9_spill] sm:$0xff] %v2267_v0  ;;  %v1620_v35 = vpack.c.bf16 %v2267_v0, %v2264_v14  ;;  %v349_v43 = vmul.f32 0.6931472, %v1731_v61  ;;  %v385_v42 = vadd.f32 %v335_v26, %v161_v53  ;;  %v524_v30 = vmul.f32 0.005, %v496_v8  ;;  %v1735_v5 = vpop.eup %1734  ;;  %s3058_s1 = sld [smem:[#allocation22_spill]] }
  0x44   :  { %v531_v31 = vmul.f32 0.005, %v503_v17  ;;  %v175_v62 = vmax.f32 %v2102_v28, 0.0  ;;  %v220_v50 = vsub.f32 0.0, %v192_v25  ;;  %v242_v51 = vmul.f32 1.442695, %v213_v33 }
  0x45   :  { %1621 = vmatpush1.bf16.xpose.msra.mxu0 %v1620_v35  ;;  %v392_v55 = vadd.f32 %v349_v43, %v168_v57  ;;  %v441_v59 = vmul.f32 %v2211_v32, %v385_v42  ;;  %v2282_v6 = vadd.f32 %v525_v58, %v385_v42  ;;  %v333_v63 = vmul.f32 0.6931472, %v1733_v48  ;;  %v84_v28 = vld [vmem:[%s3037_s4 + $0x60] sm:$0xff]  ;;  %s3059_s27 = sld [smem:[#allocation21_spill]] }
  0x46   :  { %v347_v53 = vmul.f32 0.6931472, %v1735_v5  ;;  %v511_v39 = vmul.f32 %v147_v38, %v147_v38  ;;  %1744 = vpow2.f32 %v242_v51  ;;  %v256_v57 = vmul.f32 1.442695, %v220_v50 }
  0x47   :  { %v448_v32 = vmul.f32 %v2222_v49, %v392_v55  ;;  %v2294_v58 = vadd.f32 %v441_v59, %v77_v47  ;;  %v2296_v46 = vadd.f32 %v532_v3, %v392_v55  ;;  %v384_v37 = vadd.f32 %v333_v63, %v160_v13  ;;  %v67_v49 = vld [vmem:[%s3036_s26 + $0x10] sm:$0xff]  ;;  %v83_v3 = vld [vmem:[%s3037_s4 + $0x58] sm:$0xff]  ;;  %v70_v47 = vld [vmem:[%s3036_s26 + $0x28] sm:$0xff] }
  0x48   :  { %v1737_v22 = vpop.eup %1736  ;;  %v391_v4 = vadd.f32 %v347_v53, %v167_v27  ;;  %v182_v8 = vmax.f32 %v2107_v29, 0.0  ;;  %v427_v19 = vmul.f32 0.1, %v147_v38  ;;  %1746 = vpow2.f32 %v256_v57  ;;  %v2331_v55 = vld [vmem:[%s3035_s23] sm:$0xff]  ;;  %v98_v59 = vld [vmem:[%s3037_s4 + $0xd0] sm:$0xff] }
  0x49   :  { %v1739_v17 = vpop.eup %1738  ;;  %v2302_v10 = vadd.f32 %v448_v32, %v84_v28  ;;  %v440_v13 = vmul.f32 %v412_v1, %v384_v37  ;;  %v2310_v26 = vadd.f32 %v524_v30, %v384_v37  ;;  %v434_v61 = vmul.f32 0.1, %v154_v7  ;;  %v2339_v63 = vld [vmem:[%s3035_s23 + $0x30] sm:$0xff] }
  0x4a   :  { %v1741_v27 = vpop.eup %1740  ;;  %v447_v25 = vmul.f32 %v419_v15, %v391_v4  ;;  %v2312_v29 = vadd.f32 %v531_v31, %v391_v4  ;;  %v363_v33 = vmul.f32 0.6931472, %v1737_v22  ;;  %v377_v35 = vmul.f32 0.6931472, %v1739_v17  ;;  %v91_v15 = vld [vmem:[%s3037_s4 + $0x98] sm:$0xff] }
  0x4b   :  { %v1743_v43 = vpop.eup %1742  ;;  %v1622_v42 = vpack.c.bf16 %v2302_v10, %v2294_v58  ;;  %v2319_v48 = vadd.f32 %v440_v13, %v76_v52  ;;  %v539_v1 = vmul.f32 0.005, %v511_v39  ;;  %v314_v30 = vadd.f32 1.0, %v1741_v27  ;;  %v2363_v13 = vld [vmem:[%s3035_s23 + $0x68] sm:$0xff] }
  0x4c   :  { %887 = vmatmul.mubr.f32.vlgmr.msra.gmra.mrb[0].mxu0 %v67_v49  ;;  %v2321_v50 = vadd.f32 %v447_v25, %v83_v3  ;;  %v399_v31 = vadd.f32 %v363_v33, %v175_v62  ;;  %v2326_v51 = vadd.f32 %v377_v35, %v182_v8  ;;  %v321_v5 = vadd.f32 1.0, %v1743_v43  ;;  %v2344_v62 = vld [vmem:[%s3035_s23 + $0x38] sm:$0xff] }
  0x4d   :  { %1623 = vmatprep.subr.bf16.mxu0 %v1622_v42  ;;  %1748 = vlog2.f32 %v314_v30  ;;  %956 = vmatprep.mubr.f32.mxu0 %v70_v47  ;;  %v184_v39 = vand.u32 2147483647, %v2331_v55  ;;  %v190_v22 = vand.u32 2147483647, %v2339_v63  ;;  %v191_v52 = vand.u32 2147483647, %v2344_v62 }
  0x4e   :  { %3043 = vst [vmem:[#allocation10_spill] sm:$0xff] %v2326_v51  ;;  %v1624_v38 = vpack.c.bf16 %v2321_v50, %v2319_v48  ;;  %v455_v28 = vmul.f32 %v427_v19, %v399_v31  ;;  %v462_v53 = vmul.f32 %v434_v61, %v2326_v51  ;;  %v2349_v7 = vadd.f32 %v539_v1, %v399_v31  ;;  %v146_v61 = vld [vmem:[%s3006_s13 + $0x90] sm:$0xff]  ;;  %v153_v42 = vld [vmem:[%s3006_s13 + $0xc8] sm:$0xff]  ;;  %v2376_v30 = vld [vmem:[%s3035_s23 + $0x78] sm:$0xff] }
  0x4f   :  { %1750 = vlog2.f32 %v321_v5  ;;  %v212_v8 = vsub.f32 0.0, %v184_v39  ;;  %v218_v49 = vsub.f32 0.0, %v190_v22  ;;  %v219_v3 = vsub.f32 0.0, %v191_v52  ;;  %v129_v5 = vld [vmem:[%s3006_s13 + $0x8] sm:$0xff] }
  0x50   :  { %3044 = vst [vmem:[#allocation11_spill] sm:$0xff] %v2349_v7  ;;  %v1745_v57 = vpop.eup %1744  ;;  %1625 = vmatpush1.bf16.xpose.msra.mxu0 %v1624_v38  ;;  %v2352_v32 = vadd.f32 %v455_v28, %v91_v15  ;;  %v2354_v37 = vadd.f32 %v462_v53, %v98_v59  ;;  %v510_v33 = vmul.f32 %v146_v61, %v146_v61  ;;  %v197_v43 = vand.u32 2147483647, %v2363_v13  ;;  %v2385_v38 = vld [vmem:[%s3035_s23 + $0xb0] sm:$0xff] }
  0x51   :  { %v297_v4 = vadd.f32 1.0, %v1745_v57  ;;  %v240_v25 = vmul.f32 1.442695, %v212_v8  ;;  %v252_v35 = vmul.f32 1.442695, %v218_v49  ;;  %v174_v1 = vmax.f32 %v2156_v40, 0.0 }
  0x52   :  { %3045 = vst [vmem:[#allocation12_spill] sm:$0xff] %v2352_v32  ;;  %3046 = vst [vmem:[#allocation13_spill] sm:$0xff] %v2354_v37  ;;  %v1747_v19 = vpop.eup %1746  ;;  %v1626_v17 = vpack.c.bf16 %v2354_v37, %v2352_v32  ;;  %v254_v47 = vmul.f32 1.442695, %v219_v3  ;;  %v181_v31 = vmax.f32 %v2188_v12, 0.0  ;;  %v225_v59 = vsub.f32 0.0, %v197_v43 }
  0x53   :  { %v304_v27 = vadd.f32 1.0, %v1747_v19  ;;  %1752 = vlog2.f32 %v297_v4  ;;  %v426_v28 = vmul.f32 0.1, %v146_v61  ;;  %v538_v53 = vmul.f32 0.005, %v510_v33  ;;  %v136_v19 = vld [vmem:[%s3006_s13 + $0x40] sm:$0xff] }
  0x54   :  { %1627 = vmatprep.subr.bf16.mxu0 %v1626_v17  ;;  %v433_v57 = vmul.f32 0.1, %v153_v42  ;;  %v493_v22 = vmul.f32 %v129_v5, %v129_v5  ;;  %v266_v52 = vmul.f32 1.442695, %v225_v59  ;;  %v199_v12 = vand.u32 2147483647, %v2376_v30 }
  0x55   :  { %1754 = vlog2.f32 %v304_v27  ;;  %v157_v17 = vmax.f32 %v2241_v21, 0.0  ;;  %v206_v49 = vand.u32 2147483647, %v2385_v38  ;;  %v90_v3 = vld [vmem:[%s3037_s4 + $0x90] sm:$0xff]  ;;  %v164_v61 = vmax.f32 %v2262_v24, 0.0  ;;  %v97_v33 = vld [vmem:[%s3037_s4 + $0xc8] sm:$0xff] }
  0x56   :  { %1756 = vpow2.f32 %v240_v25  ;;  %v500_v27 = vmul.f32 %v136_v19, %v136_v19  ;;  %v227_v25 = vsub.f32 0.0, %v199_v12  ;;  %v2410_v12 = vld [vmem:[%s3035_s23 + $0x70] sm:$0xff]  ;;  %vm1875_vm0 = vmmov 0   ;;  %v85_v32 = vld [vmem:[%s3037_s4 + $0x68] sm:$0xff] }
  0x57   :  { %v1749_v15 = vpop.eup %1748  ;;  %1758 = vpow2.f32 %v252_v35  ;;  %v234_v21 = vsub.f32 0.0, %v206_v49  ;;  %v2422_v49 = vld [vmem:[%s3035_s23 + $0xa8] sm:$0xff]  ;;  %vm581_vm1 = vcmask 130048   ;;  %vm1105_vm3 = vcmask 261120  }
  0x58   :  { %v361_v40 = vmul.f32 0.6931472, %v1749_v15  ;;  %1760 = vpow2.f32 %v254_v47  ;;  %v521_v15 = vmul.f32 0.005, %v493_v22  ;;  %v270_v59 = vmul.f32 1.442695, %v227_v25  ;;  %vm2521_vm2 = vmpackc.low %vm581_vm1, %vm581_vm1 }
  0x59   :  { %v1751_v39 = vpop.eup %1750  ;;  %1762 = vpow2.f32 %v266_v52  ;;  %v284_v52 = vmul.f32 1.442695, %v234_v21  ;;  %v73_v25 = vld [vmem:[%s3037_s4 + $0x8] sm:$0xff]  ;;  %vm706_vm4 = vcmask 253952   ;;  %vm1339_vm5 = vcmask 80896  }
  0x5a   :  { %v375_v4 = vmul.f32 0.6931472, %v1751_v39  ;;  %v398_v8 = vadd.f32 %v361_v40, %v174_v1  ;;  %v409_v1 = vmul.f32 0.1, %v129_v5  ;;  %v416_v5 = vmul.f32 0.1, %v136_v19 }
  0x5b   :  { %1764 = vpow2.f32 %v270_v59  ;;  %v198_v19 = vand.u32 2147483647, %v2410_v12  ;;  %vm1397_vm6 = vcmask 73728  }
  0x5c   :  { %v2400_v35 = vadd.f32 %v375_v4, %v181_v31  ;;  %v454_v47 = vmul.f32 %v426_v28, %v398_v8  ;;  %v2402_v43 = vadd.f32 %v538_v53, %v398_v8  ;;  %v2415_v31 = vld [vmem:[%s3035_s23 + $0xa0] sm:$0xff]  ;;  %v528_v8 = vmul.f32 0.005, %v500_v27 }
  0x5d   :  { %v1753_v42 = vpop.eup %1752  ;;  %1766 = vpow2.f32 %v284_v52  ;;  %v205_v52 = vand.u32 2147483647, %v2422_v49 }
  0x5e   :  { %3047 = vst [vmem:[#allocation14_spill] sm:$0xff] %v2400_v35  ;;  %3048 = vst [vmem:[#allocation15_spill] sm:$0xff] %v2402_v43  ;;  %v461_v40 = vmul.f32 %v433_v57, %v2400_v35  ;;  %v2405_v24 = vadd.f32 %v454_v47, %v90_v3  ;;  %v327_v39 = vmul.f32 0.6931472, %v1753_v42  ;;  %v226_v35 = vsub.f32 0.0, %v198_v19  ;;  %v2455_v19 = vld [vmem:[%s3035_s23 + $0xd8] sm:$0xff] }
  0x5f   :  { %v1755_v28 = vpop.eup %1754 }
  0x60   :  { %3049 = vst [vmem:[#allocation16_spill] sm:$0xff] %v2405_v24  ;;  %v1757_v53 = vpop.eup %1756  ;;  %v2417_v22 = vadd.f32 %v461_v40, %v97_v33  ;;  %v341_v57 = vmul.f32 0.6931472, %v1755_v28  ;;  %v381_v4 = vadd.f32 %v327_v39, %v157_v17  ;;  %v204_v33 = vand.u32 2147483647, %v2415_v31  ;;  %v80_v40 = vld [vmem:[%s3037_s4 + $0x40] sm:$0xff] }
  0x61   :  { %v1759_v3 = vpop.eup %1758  ;;  %v296_v47 = vadd.f32 1.0, %v1757_v53 }
  0x62   :  { %3050 = vst [vmem:[#allocation17_spill] sm:$0xff] %v2417_v22  ;;  %v1761_v21 = vpop.eup %1760  ;;  %v1628_v17 = vpack.c.bf16 %v2417_v22, %v2405_v24  ;;  %v388_v27 = vadd.f32 %v341_v57, %v164_v61  ;;  %v437_v42 = vmul.f32 %v409_v1, %v381_v4  ;;  %v2431_v59 = vadd.f32 %v521_v15, %v381_v4 }
  0x63   :  { %v302_v39 = vadd.f32 1.0, %v1759_v3  ;;  %v303_v28 = vadd.f32 1.0, %v1761_v21  ;;  %1768 = vlog2.f32 %v296_v47  ;;  %v1763_v61 = vpop.eup %1762  ;;  %v3020_v1 = vmov 0.0|0.0  }
  0x64   :  { %1629 = vmatpush1.bf16.xpose.msra.mxu0 %v1628_v17  ;;  %v444_v53 = vmul.f32 %v416_v5, %v388_v27  ;;  %v2437_v45 = vadd.f32 %v437_v42, %v73_v25  ;;  %v2439_v51 = vadd.f32 %v528_v8, %v388_v27  ;;  %v232_v15 = vsub.f32 0.0, %v204_v33 }
  0x65   :  { %1770 = vlog2.f32 %v302_v39  ;;  %1630 = vmatprep.subr.bf16.mxu0 %v3020_v1  ;;  %v233_v57 = vsub.f32 0.0, %v205_v52  ;;  %v309_v3 = vadd.f32 1.0, %v1763_v61  ;;  %v2446_v47 = vmul.f32 %v2151_v36, %v2151_v36  ;;  %v1765_v17 = vpop.eup %1764 }
  0x66   :  { %v2442_v4 = vadd.f32 %v444_v53, %v80_v40  ;;  %1772 = vlog2.f32 %v303_v28  ;;  %v2450_v5 = vmul.f32 %v2190_v9, %v2190_v9  ;;  %v268_v8 = vmul.f32 1.442695, %v226_v35  ;;  %v128_v9 = vld [vmem:[%s3006_s13] sm:$0xff]  ;;  %v135_v40 = vld [vmem:[%s3006_s13 + $0x38] sm:$0xff] }
  0x67   :  { %v280_v25 = vmul.f32 1.442695, %v232_v15  ;;  %v2459_v33 = vmul.f32 %v2294_v58, %v2294_v58  ;;  %v2463_v21 = vmul.f32 %v2319_v48, %v2319_v48  ;;  %v69_v35 = vld [vmem:[%s3036_s26 + $0x20] sm:$0xff]  ;;  %1774 = vlog2.f32 %v309_v3  ;;  %v134_v58 = vld [vmem:[%s3006_s13 + $0x30] sm:$0xff]  ;;  %v1767_v61 = vpop.eup %1766 }
  0x68   :  { %v1606_v36 = vpack.c.bf16 %v2442_v4, %v2437_v45  ;;  %v156_v48 = vmax.f32 %v2331_v55, 0.0  ;;  %v492_v27 = vmul.f32 %v128_v9, %v128_v9  ;;  %1776 = vpow2.f32 %v268_v8  ;;  %v141_v55 = vld [vmem:[%s3006_s13 + $0x68] sm:$0xff] }
  0x69   :  { %v282_v42 = vmul.f32 1.442695, %v233_v57  ;;  %v162_v39 = vmax.f32 %v2339_v63, 0.0  ;;  %v498_v28 = vmul.f32 %v134_v58, %v134_v58  ;;  %v311_v52 = vadd.f32 1.0, %v1765_v17  ;;  %v143_v63 = vld [vmem:[%s3006_s13 + $0x78] sm:$0xff] }
  0x6a   :  { %1607 = vmatprep.subr.bf16.mxu1 %v1606_v36  ;;  %v211_v53 = vand.u32 2147483647, %v2455_v19  ;;  %v163_v15 = vmax.f32 %v2344_v62, 0.0  ;;  %v408_v3 = vmul.f32 0.1, %v128_v9  ;;  %v499_v1 = vmul.f32 %v135_v40, %v135_v40 }
  0x6b   :  { %957 = vmatmul.mubr.f32.vlgmr.msra.gmra.mrb[0].mxu0 %v69_v35  ;;  %1778 = vpow2.f32 %v280_v25  ;;  %v505_v57 = vmul.f32 %v141_v55, %v141_v55  ;;  %v318_v8 = vadd.f32 1.0, %v1767_v61  ;;  %v3051_v17 = vmov 0.0  }
  0x6c   :  { %1780 = vlog2.f32 %v311_v52  ;;  %v239_v36 = vsub.f32 0.0, %v211_v53  ;;  %1581 = vmatprep.mubr.msk.f32.mxu0 %vm1875_vm0, %v3051_v17  ;;  %v414_v9 = vmul.f32 0.1, %v134_v58  ;;  %v415_v35 = vmul.f32 0.1, %v135_v40  ;;  %v150_v58 = vld [vmem:[%s3006_s13 + $0xb0] sm:$0xff] }
  0x6d   :  { %v1769_v62 = vpop.eup %1768  ;;  %v520_v20 = vmul.f32 0.005, %v492_v27  ;;  %1782 = vpow2.f32 %v282_v42  ;;  %v526_v7 = vmul.f32 0.005, %v498_v28  ;;  %v527_v43 = vmul.f32 0.005, %v499_v1 }
  0x6e   :  { %v325_v56 = vmul.f32 0.6931472, %v1769_v62  ;;  %1784 = vlog2.f32 %v318_v8  ;;  %v294_v25 = vmul.f32 1.442695, %v239_v36  ;;  %v169_v61 = vmax.f32 %v2363_v13, 0.0  ;;  %v72_v1 = vld [vmem:[%s3037_s4] sm:$0xff] }
  0x6f   :  { %v1771_v37 = vpop.eup %1770  ;;  %v421_v52 = vmul.f32 0.1, %v141_v55  ;;  %v171_v53 = vmax.f32 %v2376_v30, 0.0  ;;  %v533_v0 = vmul.f32 0.005, %v505_v57  ;;  %v178_v27 = vmax.f32 %v2385_v38, 0.0 }
  0x70   :  { %v1773_v22 = vpop.eup %1772  ;;  %v337_v44 = vmul.f32 0.6931472, %v1771_v37  ;;  %v380_v17 = vadd.f32 %v325_v56, %v156_v48  ;;  %v423_v40 = vmul.f32 0.1, %v143_v63  ;;  %v507_v13 = vmul.f32 %v143_v63, %v143_v63  ;;  %v78_v62 = vld [vmem:[%s3037_s4 + $0x30] sm:$0xff] }
  0x71   :  { %v339_v42 = vmul.f32 0.6931472, %v1773_v22  ;;  %v514_v28 = vmul.f32 %v150_v58, %v150_v58  ;;  %v1775_v55 = vpop.eup %1774  ;;  %1786 = vpow2.f32 %v294_v25  ;;  %v619_v48 = vmul.f32 %v2437_v45, %v2437_v45  ;;  %v79_v22 = vld [vmem:[%s3037_s4 + $0x38] sm:$0xff] }
  0x72   :  { %v386_v30 = vadd.f32 %v337_v44, %v162_v39  ;;  %v436_v8 = vmul.f32 %v408_v3, %v380_v17  ;;  %v548_v37 = vadd.f32 %v520_v20, %v380_v17  ;;  %v1777_v56 = vpop.eup %1776  ;;  %v351_v36 = vmul.f32 0.6931472, %v1775_v55 }
  0x73   :  { %v387_v57 = vadd.f32 %v339_v42, %v163_v15  ;;  %v430_v38 = vmul.f32 0.1, %v150_v58  ;;  %v535_v15 = vmul.f32 0.005, %v507_v13  ;;  %v542_v24 = vmul.f32 0.005, %v514_v28 }
  0x74   :  { %v442_v63 = vmul.f32 %v414_v9, %v386_v30  ;;  %v464_v44 = vadd.f32 %v436_v8, %v72_v1  ;;  %v554_v39 = vadd.f32 %v526_v7, %v386_v30  ;;  %v576_v20 = vadd.f32 %v2431_v59, %v548_v37 }
  0x75   :  { %v1779_v3 = vpop.eup %1778  ;;  %v443_v25 = vmul.f32 %v415_v35, %v387_v57  ;;  %v555_v17 = vadd.f32 %v527_v43, %v387_v57  ;;  %v393_v45 = vadd.f32 %v351_v36, %v169_v61  ;;  %v310_v18 = vadd.f32 1.0, %v1777_v56 }
  0x76   :  { %v1781_v42 = vpop.eup %1780  ;;  %v577_v58 = vadd.f32 %v576_v20, %v2176_v60  ;;  %v618_v55 = vmul.f32 %v464_v44, %v464_v44  ;;  %v470_v1 = vadd.f32 %v442_v63, %v78_v62  ;;  %v582_v35 = vsel %vm581_vm1, %v554_v39, 0.0 }
  0x77   :  { %v1783_v9 = vpop.eup %1782  ;;  %v471_v7 = vadd.f32 %v443_v25, %v79_v22  ;;  %v449_v30 = vmul.f32 %v421_v52, %v393_v45  ;;  %v355_v59 = vmul.f32 0.6931472, %v1781_v42  ;;  %v316_v13 = vadd.f32 1.0, %v1779_v3 }
  0x78   :  { %v1785_v8 = vpop.eup %1784  ;;  %v578_v43 = vadd.f32 %v577_v58, %v2140_v23  ;;  %v646_v61 = vadd.f32 %v619_v48, %v618_v55  ;;  %v624_v60 = vmul.f32 %v470_v1, %v470_v1  ;;  %v317_v62 = vadd.f32 1.0, %v1783_v9 }
  0x79   :  { %v1608_v37 = vpack.c.bf16 %v471_v7, %v464_v44  ;;  %v2515_v57 = vadd.f32 %v449_v30, %v85_v32  ;;  %v369_v36 = vmul.f32 0.6931472, %v1785_v8  ;;  %v395_v23 = vadd.f32 %v355_v59, %v171_v53  ;;  %v87_v32 = vld [vmem:[%s3037_s4 + $0x78] sm:$0xff]  ;;  %v94_v53 = vld [vmem:[%s3037_s4 + $0xb0] sm:$0xff] }
  0x7a   :  { %v579_v28 = vadd.f32 %v578_v43, %v2310_v26  ;;  %v647_v56 = vadd.f32 %v646_v61, %v2450_v5  ;;  %1788 = vlog2.f32 %v310_v18  ;;  %v561_v26 = vadd.f32 %v533_v0, %v393_v45 }
  0x7b   :  { %1609 = vmatpush1.bf16.xpose.msra.mxu1 %v1608_v37  ;;  %v1631_v48 = vpack.c.bf16 %v2515_v57, %v470_v1  ;;  %v402_v22 = vadd.f32 %v369_v36, %v178_v27  ;;  %v1787_v63 = vpop.eup %1786  ;;  %v451_v39 = vmul.f32 %v423_v40, %v395_v23  ;;  %v2534_v20 = vadd.f32 %v535_v15, %v395_v23 }
  0x7c   :  { %v580_v5 = vadd.f32 %v579_v28, %v2282_v6  ;;  %v648_v44 = vadd.f32 %v647_v56, %v2446_v47  ;;  %1790 = vlog2.f32 %v316_v13  ;;  %v3054_v47 = vmov 0.0|0.0  }
  0x7d   :  { %1633 = vmatpush3.bf16.xpose.msk.msra.mxu0 %vm2521_vm2, %v1631_v48  ;;  %v458_v3 = vmul.f32 %v430_v38, %v402_v22  ;;  %v2538_v25 = vadd.f32 %v542_v24, %v402_v22  ;;  %v2541_v6 = vadd.f32 %v451_v39, %v87_v32  ;;  %1792 = vlog2.f32 %v317_v62  ;;  %v86_v32 = vld [vmem:[%s3037_s4 + $0x70] sm:$0xff] }
  0x7e   :  { %v583_v18 = vadd.f32 %v582_v35, %v580_v5  ;;  %v649_v0 = vadd.f32 %v648_v44, %v2463_v21  ;;  %1634 = vmatprep.subr.bf16.mxu0 %v3054_v47  ;;  %v651_v27 = vsel %vm581_vm1, %v624_v60, 0.0  ;;  %v323_v45 = vadd.f32 1.0, %v1787_v63  ;;  %v142_v21 = vld [vmem:[%s3006_s13 + $0x70] sm:$0xff] }
  0x7f   :  { %v2545_v40 = vadd.f32 %v458_v3, %v94_v53  ;;  %v625_v42 = vmul.f32 %v471_v7, %v471_v7  ;;  %v626_v58 = vmul.f32 %v2442_v4, %v2442_v4  ;;  %v506_v1 = vmul.f32 %v142_v21, %v142_v21 }
  0x80   :  { %v584_v15 = vadd.f32 %v583_v18, %v555_v17  ;;  %v650_v38 = vadd.f32 %v649_v0, %v2459_v33  ;;  %1794 = vlog2.f32 %v323_v45  ;;  %v149_v17 = vld [vmem:[%s3006_s13 + $0xa8] sm:$0xff]  ;;  %v628_v33 = vmul.f32 %v2158_v54, %v2158_v54 }
  0x81   :  { %v1610_v24 = vpack.c.bf16 %v2545_v40, %v2541_v6  ;;  %v513_v7 = vmul.f32 %v149_v17, %v149_v17  ;;  %v627_v30 = vmul.f32 %v2195_v16, %v2195_v16  ;;  %v170_v4 = vmax.f32 %v2410_v12, 0.0 }
  0x82   :  { %v585_v55 = vadd.f32 %v584_v15, %v2439_v51  ;;  %v652_v9 = vadd.f32 %v651_v27, %v650_v38  ;;  %v2567_v51 = vld [vmem:[%s3006_s13 + $0xa0] sm:$0xff]  ;;  %v630_v35 = vmul.f32 %v2302_v10, %v2302_v10  ;;  %v176_v54 = vmax.f32 %v2415_v31, 0.0 }
  0x83   :  { %1611 = vmatprep.subr.bf16.mxu1 %v1610_v24  ;;  %v177_v61 = vmax.f32 %v2422_v49, 0.0  ;;  %v422_v13 = vmul.f32 0.1, %v142_v21  ;;  %v534_v37 = vmul.f32 0.005, %v506_v1  ;;  %v629_v28 = vmul.f32 %v2321_v50, %v2321_v50 }
  0x84   :  { %v586_v59 = vadd.f32 %v585_v55, %v2181_v2  ;;  %v653_v8 = vadd.f32 %v652_v9, %v625_v42  ;;  %v1789_v43 = vpop.eup %1788  ;;  %v428_v12 = vmul.f32 0.1, %v2567_v51  ;;  %v429_v56 = vmul.f32 0.1, %v149_v17  ;;  %v92_v42 = vld [vmem:[%s3037_s4 + $0xa0] sm:$0xff] }
  0x85   :  { %v353_v60 = vmul.f32 0.6931472, %v1789_v43  ;;  %v541_v23 = vmul.f32 0.005, %v513_v7  ;;  %v590_v22 = vsel %vm581_vm1, %v561_v26, 0.0  ;;  %v631_v63 = vmul.f32 %v2515_v57, %v2515_v57  ;;  %v93_v26 = vld [vmem:[%s3037_s4 + $0xa8] sm:$0xff] }
  0x86   :  { %v587_v16 = vadd.f32 %v586_v59, %v2146_v41  ;;  %v654_v2 = vadd.f32 %v653_v8, %v626_v58  ;;  %v1791_v36 = vpop.eup %1790  ;;  %v2582_v41 = vld [vmem:[%s3006_s13 + $0xd8] sm:$0xff]  ;;  %v633_v7 = vmul.f32 %v2541_v6, %v2541_v6 }
  0x87   :  { %v1793_v62 = vpop.eup %1792  ;;  %v365_v48 = vmul.f32 0.6931472, %v1791_v36  ;;  %v394_v49 = vadd.f32 %v353_v60, %v170_v4  ;;  %v435_v27 = vmul.f32 0.1, %v2582_v41  ;;  %v3055_v60 = vld [vmem:[#allocation6_spill] sm:$0xff] }
  0x88   :  { %v588_v10 = vadd.f32 %v587_v16, %v2312_v29  ;;  %v655_v31 = vadd.f32 %v654_v2, %v627_v30  ;;  %v367_v50 = vmul.f32 0.6931472, %v1793_v62  ;;  %v183_v29 = vmax.f32 %v2455_v19, 0.0  ;;  %v71_v62 = vld [vmem:[%s3036_s26 + $0x30] sm:$0xff] }
  0x89   :  { %v2591_v44 = vadd.f32 %v365_v48, %v176_v54  ;;  %v450_v53 = vmul.f32 %v422_v13, %v394_v49  ;;  %v562_v39 = vadd.f32 %v534_v37, %v394_v49  ;;  %v635_v16 = vmul.f32 %v2218_v34, %v2218_v34  ;;  %v3056_v37 = vld [vmem:[#allocation16_spill] sm:$0xff] }
  0x8a   :  { %v656_v5 = vadd.f32 %v655_v31, %v628_v33  ;;  %v1795_v3 = vpop.eup %1794  ;;  %v401_v18 = vadd.f32 %v367_v50, %v177_v61  ;;  %v589_v0 = vadd.f32 %v588_v10, %v2296_v46  ;;  %v659_v46 = vsel %vm581_vm1, %v631_v63, 0.0  ;;  %v99_v33 = vld [vmem:[%s3037_s4 + $0xd8] sm:$0xff]  ;;  %v65_v34 = vld [vmem:[%s3036_s26] sm:$0xff] }
  0x8b   :  { %v456_v57 = vmul.f32 %v428_v12, %v2591_v44  ;;  %v478_v15 = vadd.f32 %v450_v53, %v86_v32  ;;  %v379_v19 = vmul.f32 0.6931472, %v1795_v3  ;;  %v2639_v31 = vld [vmem:[#allocation2] sm:$0xff]  ;;  %v1040_v3 = vld [vmem:[%s2999_s6 + $0x18] sm:$0xff] }
  0x8c   :  { %v657_v45 = vadd.f32 %v656_v5, %v629_v28  ;;  %v457_v38 = vmul.f32 %v429_v56, %v401_v18  ;;  %v2602_v24 = vadd.f32 %v541_v23, %v401_v18  ;;  %v591_v21 = vadd.f32 %v590_v22, %v589_v0  ;;  %v3057_v28 = vld [vmem:[#allocation12_spill] sm:$0xff]  ;;  %v1038_v22 = vld [vmem:[%s2999_s6 + $0x8] sm:$0xff] }
  0x8d   :  { %v632_v58 = vmul.f32 %v478_v15, %v478_v15  ;;  %v2605_v9 = vadd.f32 %v379_v19, %v183_v29  ;;  %v484_v30 = vadd.f32 %v456_v57, %v92_v42  ;;  %v637_v12 = vmul.f32 %v3057_v28, %v3057_v28  ;;  %v1037_v50 = vld [vmem:[%s2999_s6] sm:$0xff]  ;;  %v1034_v28 = vld [vmem:[%s2998_s5 + $0x8] sm:$0xff] }
  0x8e   :  { %v658_v55 = vadd.f32 %v657_v45, %v630_v35  ;;  %v485_v17 = vadd.f32 %v457_v38, %v93_v26  ;;  %v592_v1 = vadd.f32 %v591_v21, %v562_v39  ;;  %v634_v35 = vmul.f32 %v2264_v14, %v2264_v14  ;;  %v1039_v39 = vld [vmem:[%s2999_s6 + $0x10] sm:$0xff] }
  0x8f   :  { %v463_v8 = vmul.f32 %v435_v27, %v2605_v9  ;;  %v636_v14 = vmul.f32 %v3056_v37, %v3056_v37  ;;  %v1049_v63 = vand.u32 2147483647, %v1037_v50  ;;  %v1050_v29 = vand.u32 2147483647, %v1038_v22 }
  0x90   :  { %v660_v59 = vadd.f32 %v659_v46, %v658_v55  ;;  %v593_v4 = vadd.f32 %v592_v1, %v2534_v20  ;;  %v1612_v43 = vpack.c.bf16 %v485_v17, %v478_v15  ;;  %v639_v52 = vmul.f32 %v485_v17, %v485_v17 }
  0x91   :  { %v2616_v61 = vadd.f32 %v463_v8, %v99_v33  ;;  %v1053_v5 = vsub.f32 0.0, %v1049_v63  ;;  %v1054_v53 = vsub.f32 0.0, %v1050_v29  ;;  %v1051_v27 = vand.u32 2147483647, %v1039_v39 }
  0x92   :  { %v661_v54 = vadd.f32 %v660_v59, %v632_v58  ;;  %v594_v13 = vadd.f32 %v593_v4, %v2248_v11  ;;  %1613 = vmatpush1.bf16.xpose.msra.mxu1 %v1612_v43  ;;  %v638_v11 = vmul.f32 %v484_v30, %v484_v30  ;;  %v1052_v45 = vand.u32 2147483647, %v1040_v3  ;;  %v2661_v4 = vld [vmem:[%s3008_s15] sm:$0xff]  ;;  %v2666_v43 = vld [vmem:[%s3008_s15 + $0x8] sm:$0xff] }
  0x93   :  { %v1635_v2 = vpack.c.bf16 %v2616_v61, %v484_v30  ;;  %1638 = vmatprep.subr.bf16.mxu1 %v3054_v47  ;;  %v1057_v18 = vmul.f32 1.442695, %v1053_v5  ;;  %v1059_v0 = vmul.f32 1.442695, %v1054_v53  ;;  %v1055_v26 = vsub.f32 0.0, %v1051_v27  ;;  %v1035_v5 = vld [vmem:[%s2998_s5 + $0x10] sm:$0xff] }
  0x94   :  { %v662_v6 = vadd.f32 %v661_v54, %v633_v7  ;;  %v2624_v20 = vadd.f32 %v594_v13, %v3055_v60  ;;  %v667_v10 = vsel %vm581_vm1, %v638_v11, 0.0  ;;  %v1056_v57 = vsub.f32 0.0, %v1052_v45  ;;  %v1036_v53 = vld [vmem:[%s2998_s5 + $0x18] sm:$0xff]  ;;  %v689_v27 = vld [vmem:[%s3058_s1] sm:$0x1] }
  0x95   :  { %1637 = vmatpush3.bf16.xpose.msk.msra.mxu0 %vm2521_vm2, %v1635_v2  ;;  %1796 = vpow2.f32 %v1057_v18  ;;  %v1061_v15 = vmul.f32 1.442695, %v1055_v26  ;;  %v1045_v30 = vmax.f32 %v1037_v50, 0.0  ;;  %v1046_v59 = vmax.f32 %v1038_v22, 0.0 }
  0x96   :  { %v663_v36 = vadd.f32 %v662_v6, %v634_v35  ;;  %1798 = vpow2.f32 %v1059_v0  ;;  %v1063_v19 = vmul.f32 1.442695, %v1056_v57  ;;  %v1081_v13 = vmul.f32 0.1, %v2661_v4  ;;  %v1271_v57 = vld [vmem:[%s3003_s10] sm:$0xff] }
  0x97   :  { %1800 = vpow2.f32 %v1061_v15  ;;  %v692_v45 = vand.u32 2147483647, %v689_v27  ;;  %v1272_v15 = vld [vmem:[%s3003_s10 + $0x8] sm:$0xff] }
  0x98   :  { %v664_v56 = vadd.f32 %v663_v36, %v635_v16  ;;  %1802 = vpow2.f32 %v1063_v19  ;;  %v1082_v16 = vmul.f32 0.1, %v2666_v43  ;;  %v1048_v36 = vmax.f32 %v1040_v3, 0.0 }
  0x99   :  { %817 = vmatmul.mubr.f32.vlgmr.msra.gmra.mrb[0].mxu1 %v65_v34  ;;  %v1033_v34 = vld [vmem:[%s2998_s5] sm:$0xff]  ;;  %v693_v26 = vsub.f32 0.0, %v692_v45 }
  0x9a   :  { %v665_v23 = vadd.f32 %v664_v56, %v636_v14  ;;  %1592 = vmatprep.mubr.msk.f32.mxu1 %vm1875_vm0, %v2639_v31  ;;  %v1047_v14 = vmax.f32 %v1039_v39, 0.0  ;;  %v2685_v56 = vld [vmem:[%s3008_s15 + $0x10] sm:$0xff] }
  0x9b   :  { %v694_v19 = vmul.f32 1.442695, %v693_v26 }
  0x9c   :  { %v666_v48 = vadd.f32 %v665_v23, %v637_v12  ;;  %1582 = vmatmul.mubr.msk.f32.vlgmr.msra.gmra.mrb[0].mxu0 %vm581_vm1, %v71_v62 }
  0x9e   :  { %v668_v49 = vadd.f32 %v667_v10, %v666_v48  ;;  %v2692_v10 = vld [vmem:[%s3008_s15 + $0x18] sm:$0xff]  ;;  %v1083_v48 = vmul.f32 0.1, %v2685_v56 }
  0x9f   :  { %v1797_v42 = vpop.eup %1796  ;;  %v1084_v22 = vmul.f32 0.1, %v2692_v10 }
  0xa0   :  { %v2644_v32 = vadd.f32 %v668_v49, %v639_v52  ;;  %v1799_v38 = vpop.eup %1798  ;;  %v1065_v21 = vadd.f32 1.0, %v1797_v42  ;;  %v1283_v42 = vand.u32 2147483647, %v1271_v57 }
  0xa1   :  { %v1066_v46 = vadd.f32 1.0, %v1799_v38  ;;  %v1801_v58 = vpop.eup %1800  ;;  %v1284_v38 = vand.u32 2147483647, %v1272_v15 }
  0xa2   :  { %1804 = vlog2.f32 %v1065_v21  ;;  %v1803_v55 = vpop.eup %1802  ;;  %v1067_v17 = vadd.f32 1.0, %v1801_v58  ;;  %v1287_v21 = vsub.f32 0.0, %v1283_v42  ;;  %v1268_v42 = vld [vmem:[%s3002_s9 + $0x8] sm:$0xff] }
  0xa3   :  { %1806 = vlog2.f32 %v1066_v46  ;;  %v1068_v1 = vadd.f32 1.0, %v1803_v55  ;;  %v1288_v46 = vsub.f32 0.0, %v1284_v38 }
  0xa4   :  { %1808 = vlog2.f32 %v1067_v17  ;;  %v1291_v58 = vmul.f32 1.442695, %v1287_v21 }
  0xa5   :  { %1810 = vlog2.f32 %v1068_v1  ;;  %v1293_v55 = vmul.f32 1.442695, %v1288_v46 }
  0xa6   :  { %1812 = vpow2.f32 %v694_v19  ;;  %v1267_v19 = vld [vmem:[%s3002_s9] sm:$0xff] }
  0xa7   :  { %1814 = vpow2.f32 %v1291_v58 }
  0xa8   :  { %1816 = vpow2.f32 %v1293_v55 }
  0xac   :  { %v1805_v33 = vpop.eup %1804 }
  0xad   :  { %v1807_v7 = vpop.eup %1806  ;;  %v1070_v8 = vmul.f32 0.6931472, %v1805_v33 }
  0xae   :  { %v1072_v35 = vmul.f32 0.6931472, %v1807_v7  ;;  %v1809_v6 = vpop.eup %1808 }
  0xaf   :  { %v2668_v54 = vadd.f32 %v1070_v8, %v1045_v30  ;;  %v1811_v60 = vpop.eup %1810  ;;  %v1074_v11 = vmul.f32 0.6931472, %v1809_v6 }
  0xb0   :  { %v2672_v2 = vadd.f32 %v1072_v35, %v1046_v59  ;;  %v1076_v23 = vmul.f32 0.6931472, %v1811_v60  ;;  %v1813_v17 = vpop.eup %1812  ;;  %v691_v35 = vmax.f32 %v689_v27, 0.0 }
  0xb1   :  { %v1085_v37 = vmul.f32 %v1081_v13, %v2668_v54  ;;  %v2694_v52 = vadd.f32 %v1074_v11, %v1047_v14  ;;  %v696_v1 = vadd.f32 1.0, %v1813_v17  ;;  %v1815_v33 = vpop.eup %1814  ;;  %v688_v11 = vld [vmem:[%s3059_s27] sm:$0x1] }
  0xb2   :  { %v1086_v12 = vmul.f32 %v1082_v16, %v2672_v2  ;;  %v2699_v50 = vadd.f32 %v1076_v23, %v1048_v36  ;;  %v1817_v7 = vpop.eup %1816  ;;  %v1299_v30 = vadd.f32 1.0, %v1815_v33  ;;  %v2732_v16 = vld [vmem:[%s3007_s14] sm:$0x1]  ;;  %v1280_v23 = vmax.f32 %v1272_v15, 0.0 }
  0xb3   :  { %v2687_v62 = vadd.f32 %v1085_v37, %v1033_v34  ;;  %v1087_v63 = vmul.f32 %v1083_v48, %v2694_v52  ;;  %1818 = vlog2.f32 %v696_v1  ;;  %v1300_v59 = vadd.f32 1.0, %v1817_v7 }
  0xb4   :  { %v2697_v49 = vadd.f32 %v1086_v12, %v1034_v28  ;;  %v1088_v39 = vmul.f32 %v1084_v22, %v2699_v50  ;;  %1820 = vlog2.f32 %v1299_v30  ;;  %v700_v60 = vmul.f32 0.1, %v2732_v16 }
  0xb5   :  { %v2712_v3 = vadd.f32 %v1087_v63, %v1035_v5  ;;  %1822 = vlog2.f32 %v1300_v59  ;;  %v732_v37 = vlaneseq  ;;  %v1279_v12 = vmax.f32 %v1271_v57, 0.0  ;;  %v2745_v63 = vld [vmem:[%s3010_s17] sm:$0xff]  ;;  %v1273_v59 = vld [vmem:[%s3003_s10 + $0x10] sm:$0xff] }
  0xb6   :  { %v1639_v29 = vpack.c.bf16 %v2697_v49, %v2687_v62  ;;  %v2714_v18 = vadd.f32 %v1088_v39, %v1036_v53  ;;  %v1315_v27 = vmul.f32 0.1, %v2745_v63 }
  0xb7   :  { %v733_v28 = vshrl.u32 %v732_v37, 7 }
  0xb8   :  { %1640 = vmatpush3.bf16.msra.mxu1 %v1639_v29  ;;  %v1642_v0 = vpack.c.bf16 %v2714_v18, %v2712_v3  ;;  %v2750_v29 = vld [vmem:[%s3010_s17 + $0x8] sm:$0xff] }
  0xb9   :  { %1641 = vmatprep.subr.bf16.mxu1 %v3054_v47  ;;  %v2754_v53 = vsub.s32 0, %v733_v28  ;;  %v1316_v45 = vmul.f32 0.1, %v2750_v29 }
  0xbc   :  { %1643 = vmatpush3.bf16.msra.mxu1 %v1642_v0 }
  0xbd   :  { %1644 = vmatprep.subr.bf16.mxu1 %v3054_v47  ;;  %v1819_v8 = vpop.eup %1818 }
  0xbe   :  { %v698_v13 = vmul.f32 0.6931472, %v1819_v8  ;;  %v1821_v14 = vpop.eup %1820  ;;  %v1274_v8 = vld [vmem:[%s3003_s10 + $0x18] sm:$0xff] }
  0xbf   :  { %v1823_v36 = vpop.eup %1822  ;;  %v1304_v48 = vmul.f32 0.6931472, %v1821_v14 }
  0xc0   :  { %v2734_v6 = vadd.f32 %v698_v13, %v691_v35  ;;  %v1306_v22 = vmul.f32 0.6931472, %v1823_v36  ;;  %v1285_v35 = vand.u32 2147483647, %v1273_v59  ;;  %v1286_v13 = vand.u32 2147483647, %v1274_v8 }
  0xc1   :  { %v2756_v39 = vadd.f32 %v1304_v48, %v1279_v12  ;;  %v1281_v48 = vmax.f32 %v1273_v59, 0.0  ;;  %v1146_v59 = vld [vmem:[%s3001_s8] sm:$0x1] }
  0xc2   :  { %v701_v34 = vmul.f32 %v700_v60, %v2734_v6  ;;  %v2758_v0 = vadd.f32 %v1306_v22, %v1280_v23  ;;  %v1289_v60 = vsub.f32 0.0, %v1285_v35  ;;  %v1290_v14 = vsub.f32 0.0, %v1286_v13 }
  0xc3   :  { %v1319_v57 = vmul.f32 %v1315_v27, %v2756_v39  ;;  %v1282_v22 = vmax.f32 %v1274_v8, 0.0  ;;  %v1149_v8 = vand.u32 2147483647, %v1146_v59 }
  0xc4   :  { %v2752_v5 = vadd.f32 %v701_v34, %v688_v11  ;;  %v1320_v15 = vmul.f32 %v1316_v45, %v2758_v0  ;;  %v1295_v36 = vmul.f32 1.442695, %v1289_v60  ;;  %v1297_v11 = vmul.f32 1.442695, %v1290_v14  ;;  %v2791_v45 = vld [vmem:[%s3010_s17 + $0x10] sm:$0xff] }
  0xc5   :  { %v2772_v58 = vadd.f32 %v1319_v57, %v1267_v19  ;;  %v1317_v19 = vmul.f32 0.1, %v2791_v45  ;;  %v1150_v35 = vsub.f32 0.0, %v1149_v8 }
  0xc6   :  { %v735_v26 = vrot.slane %v2752_v5, %v2754_v53  ;;  %v2774_v55 = vadd.f32 %v1320_v15, %v1268_v42  ;;  %1824 = vpow2.f32 %v1295_v36 }
  0xc7   :  { %1826 = vpow2.f32 %v1297_v11  ;;  %v1151_v13 = vmul.f32 1.442695, %v1150_v35  ;;  %v1148_v11 = vmax.f32 %v1146_v59, 0.0  ;;  %v3060_v59 = vld [vmem:[#allocation9_spill] sm:$0xff]  ;;  %v1845_v35 = vld [vmem:[%s3006_s13 + $0xb8] sm:$0xff] }
  0xc8   :  { %v1645_v7 = vpack.c.bf16 %v2774_v55, %v2772_v58  ;;  %v641_v8 = vmul.f32 %v3060_v59, %v3060_v59 }
  0xd0   :  { %v1825_v34 = vpop.eup %1824 }
  0xd1   :  { %v1301_v28 = vadd.f32 1.0, %v1825_v34 }
  0xd3   :  { %1828 = vlog2.f32 %v1301_v28 }
 0x16c   :  { %v818_v38 = vpop.f32.mrb[0].mxu1 }
 0x16d   :  { %v819_v21 = vadd.f32 %v818_v38, %v735_v26  ;;  %v820_v46 = vpop.f32.mrb[1].mxu1  ;;  %v2796_v26 = vld [vmem:[%s3010_s17 + $0x18] sm:$0xff] }
 0x16e   :  { %v1318_v42 = vmul.f32 0.1, %v2796_v26  ;;  %v1269_v46 = vld [vmem:[%s3002_s9 + $0x10] sm:$0xff] }
 0x16f   :  { %v1028_v17 = vpop.f32.mrb[0].mxu0 }
 0x170   :  { %v1651_v1 = vadd.f32 %v1028_v17, %v819_v21  ;;  %v1583_v33 = vpop.f32.mrb[1].mxu0  ;;  %v1270_v17 = vld [vmem:[%s3002_s9 + $0x18] sm:$0xff] }
 0x172   :  { %v1032_v30 = vmax.f32 %v1651_v1, 0.0 }
 0x174   :  { %1593 = vmatmul.mubr.msk.f32.vlgmr.msra.gmra.mrb[2].mxu1 %vm1105_vm3, %v1032_v30 }
 0x175   :  { %1646 = vmatpush3.bf16.msra.mxu1 %v1645_v7  ;;  %1603 = vmatprep.mubr.msk.f32.mxu1 %vm1875_vm0, %v2639_v31  ;;  %v1827_v31 = vpop.eup %1826 }
 0x176   :  { %1647 = vmatprep.subr.bf16.mxu1 %v3054_v47  ;;  %v1302_v47 = vadd.f32 1.0, %v1827_v31  ;;  %v1829_v12 = vpop.eup %1828  ;;  %v2824_v31 = vld [vmem:[%s3009_s16] sm:$0x1] }
 0x177   :  { %v1308_v27 = vmul.f32 0.6931472, %v1829_v12 }
 0x178   :  { %1830 = vlog2.f32 %v1302_v47  ;;  %v1157_v47 = vmul.f32 0.1, %v2824_v31 }
 0x179   :  { %v2798_v15 = vadd.f32 %v1308_v27, %v1281_v48  ;;  %1832 = vpow2.f32 %v1151_v13  ;;  %v515_v13 = vmul.f32 %v1845_v35, %v1845_v35 }
 0x17b   :  { %v1321_v21 = vmul.f32 %v1317_v19, %v2798_v15 }
 0x17d   :  { %v2812_v33 = vadd.f32 %v1321_v21, %v1269_v46  ;;  %v2841_v21 = vld [vmem:[%s3005_s12] sm:$0x1] }
 0x17e   :  { %v1383_v46 = vand.u32 2147483647, %v2841_v21 }
 0x182   :  { %v1831_v23 = vpop.eup %1830 }
 0x183   :  { %v1310_v57 = vmul.f32 0.6931472, %v1831_v23  ;;  %v1833_v60 = vpop.eup %1832  ;;  %v1145_v23 = vld [vmem:[%s3000_s7] sm:$0x1] }
 0x184   :  { %v1153_v14 = vadd.f32 1.0, %v1833_v60  ;;  %v3061_v60 = vld [vmem:[#allocation7_spill] sm:$0xff] }
 0x185   :  { %v2802_v38 = vadd.f32 %v1310_v57, %v1282_v22 }
 0x186   :  { %1834 = vlog2.f32 %v1153_v14  ;;  %v642_v14 = vmul.f32 %v3061_v60, %v3061_v60 }
 0x187   :  { %v1322_v1 = vmul.f32 %v1318_v42, %v2802_v38 }
 0x189   :  { %v2814_v7 = vadd.f32 %v1322_v1, %v1270_v17  ;;  %v1384_v17 = vsub.f32 0.0, %v1383_v46 }
 0x18b   :  { %v1648_v30 = vpack.c.bf16 %v2814_v7, %v2812_v33  ;;  %v1385_v1 = vmul.f32 1.442695, %v1384_v17 }
 0x18d   :  { %1649 = vmatpush3.bf16.msra.mxu1 %v1648_v30  ;;  %1836 = vpow2.f32 %v1385_v1  ;;  %v640_v30 = vmul.f32 %v2545_v40, %v2545_v40  ;;  %v3065_v1 = vld [vmem:[#allocation11_spill] sm:$0xff] }
 0x190   :  { %v1835_v36 = vpop.eup %1834 }
 0x191   :  { %v1155_v34 = vmul.f32 0.6931472, %v1835_v36  ;;  %v670_v36 = vadd.f32 %v2644_v32, %v640_v30  ;;  %v3064_v32 = vld [vmem:[#allocation13_spill] sm:$0xff] }
 0x192   :  { %v644_v46 = vmul.f32 %v3064_v32, %v3064_v32 }
 0x193   :  { %v2826_v28 = vadd.f32 %v1155_v34, %v1148_v11  ;;  %v512_v11 = vmul.f32 %v2567_v51, %v2567_v51  ;;  %v3062_v34 = vld [vmem:[#allocation17_spill] sm:$0xff]  ;;  %v671_v40 = vadd.f32 %v670_v36, %v641_v8  ;;  %v3066_v36 = vld [vmem:[#allocation8_spill] sm:$0xff] }
 0x195   :  { %v1158_v12 = vmul.f32 %v1157_v47, %v2826_v28  ;;  %v643_v47 = vmul.f32 %v3062_v34, %v3062_v34  ;;  %v672_v51 = vadd.f32 %v671_v40, %v642_v14  ;;  %v1094_v14 = vmul.f32 %v2666_v43, %v2666_v43 }
 0x196   :  { %v1096_v40 = vmul.f32 %v2692_v10, %v2692_v10 }
 0x197   :  { %v2833_v48 = vadd.f32 %v1158_v12, %v1145_v23  ;;  %v540_v12 = vmul.f32 0.005, %v512_v11  ;;  %v645_v23 = vmul.f32 %v2616_v61, %v2616_v61  ;;  %v673_v8 = vadd.f32 %v672_v51, %v643_v47 }
 0x199   :  { %v1191_v22 = vrot.slane %v2833_v48, %v2754_v53  ;;  %v568_v17 = vadd.f32 %v540_v12, %v2591_v44  ;;  %v1095_v44 = vmul.f32 %v2685_v56, %v2685_v56 }
 0x19b   :  { %v598_v61 = vsel %vm581_vm1, %v568_v17, 0.0 }
 0x247   :  { %v1262_v27 = vpop.f32.mrb[2].mxu1 }
 0x248   :  { %v1263_v57 = vadd.f32 %v1262_v27, %v1191_v22  ;;  %v1594_v19 = vpop.f32.mrb[3].mxu1  ;;  %v3063_v22 = vld [vmem:[#allocation15_spill] sm:$0xff] }
 0x249   :  { %v596_v27 = vadd.f32 %v2624_v20, %v3063_v22  ;;  %v1837_v19 = vpop.eup %1836  ;;  %v675_v20 = vsel %vm581_vm1, %v645_v23, 0.0  ;;  %v1099_v22 = vmul.f32 0.005, %v1095_v44 }
 0x24a   :  { %v1266_v42 = vmax.f32 %v1263_v57, 0.0  ;;  %v703_v57 = vmul.f32 %v2732_v16, %v2732_v16  ;;  %v1387_v35 = vadd.f32 1.0, %v1837_v19  ;;  %v1093_v16 = vmul.f32 %v2661_v4, %v2661_v4 }
 0x24b   :  { %v597_v30 = vadd.f32 %v596_v27, %v3065_v1  ;;  %v1098_v4 = vmul.f32 0.005, %v1094_v14  ;;  %v1329_v1 = vmul.f32 %v2791_v45, %v2791_v45 }
 0x24c   :  { %1604 = vmatmul.mubr.msk.f32.vlgmr.msra.gmra.mrb[4].mxu1 %vm1105_vm3, %v1266_v42  ;;  %v543_v42 = vmul.f32 0.005, %v515_v13  ;;  %v704_v59 = vmul.f32 0.005, %v703_v57  ;;  %v674_v13 = vadd.f32 %v673_v8, %v644_v46  ;;  %v1097_v12 = vmul.f32 0.005, %v1093_v16 }
 0x24d   :  { %v599_v60 = vadd.f32 %v598_v61, %v597_v30  ;;  %1838 = vlog2.f32 %v1387_v35  ;;  %v1100_v57 = vmul.f32 0.005, %v1096_v40  ;;  %v1102_v56 = vadd.f32 %v1098_v4, %v2672_v2 }
 0x24e   :  { %v571_v11 = vadd.f32 %v543_v42, %v3066_v36  ;;  %v705_v47 = vadd.f32 %v704_v59, %v2734_v6  ;;  %v676_v23 = vadd.f32 %v675_v20, %v674_v13  ;;  %v1101_v43 = vadd.f32 %v1097_v12, %v2668_v54 }
 0x24f   :  { %v600_v34 = vadd.f32 %v599_v60, %v2602_v24  ;;  %v1103_v24 = vadd.f32 %v1099_v22, %v2694_v52  ;;  %v1104_v19 = vadd.f32 %v1100_v57, %v2699_v50  ;;  %v1107_v32 = vsel %vm1105_vm3, %v1102_v56, 0.0  ;;  %v1847_v22 = vld [vmem:[%s3006_s13 + $0xc8] sm:$0xff]  ;;  %v1848_v56 = vld [vmem:[%s3006_s13 + $0xd0] sm:$0xff] }
 0x250   :  { %677 = vadd.xlane.f32.xlu1 %v676_v23  ;;  %v707_v10 = vsel %vm706_vm4, %v705_v47, 0.0  ;;  %v1106_v42 = vsel %vm1105_vm3, %v1101_v43, 0.0  ;;  %v1160_v2 = vmul.f32 %v2824_v31, %v2824_v31  ;;  %v1327_v52 = vmul.f32 %v2745_v63, %v2745_v63  ;;  %v1846_v23 = vld [vmem:[%s3006_s13 + $0xc0] sm:$0xff] }
 0x251   :  { %v601_v27 = vadd.f32 %v600_v34, %v2538_v25  ;;  %v1109_v25 = vsel %vm1105_vm3, %v1103_v24, 0.0  ;;  %v1108_v46 = vadd.f32 %v1107_v32, %v1106_v42  ;;  %v1111_v54 = vsel %vm1105_vm3, %v1104_v19, 0.0  ;;  %v3067_v42 = vld [vmem:[#allocation5_spill] sm:$0xff] }
 0x252   :  { %v1328_v50 = vmul.f32 %v2750_v29, %v2750_v29  ;;  %v1161_v17 = vmul.f32 0.005, %v1160_v2  ;;  %v1330_v30 = vmul.f32 %v2796_v26, %v2796_v26  ;;  %v1331_v8 = vmul.f32 0.005, %v1327_v52  ;;  %v3068_v52 = vld [vmem:[#allocation14_spill] sm:$0xff] }
 0x253   :  { %v2885_v6 = vadd.f32 %v601_v27, %v571_v11  ;;  %v1110_v51 = vadd.f32 %v1109_v25, %v1108_v46  ;;  %v1333_v31 = vmul.f32 0.005, %v1329_v1  ;;  %v516_v4 = vmul.f32 %v1846_v23, %v1846_v23  ;;  %v1379_v46 = vld [vmem:[%s3004_s11] sm:$0x1]  ;;  %v3069_v1 = vld [vmem:[#allocation10_spill] sm:$0xff] }
 0x254   :  { %708 = vadd.xlane.f32.xlu1 %v707_v10  ;;  %v1162_v61 = vadd.f32 %v1161_v17, %v2826_v28  ;;  %v1332_v35 = vmul.f32 0.005, %v1328_v50  ;;  %v1334_v20 = vmul.f32 0.005, %v1330_v30  ;;  %v1335_v63 = vadd.f32 %v1331_v8, %v2756_v39  ;;  %v1381_v39 = vld [vmem:[%s3011_s18] sm:$0x1] }
 0x255   :  { %v1112_v59 = vadd.f32 %v1111_v54, %v1110_v51  ;;  %v1337_v45 = vadd.f32 %v1333_v31, %v2798_v15  ;;  %v1382_v28 = vmax.f32 %v2841_v21, 0.0  ;;  %v1394_v15 = vmul.f32 %v1381_v39, %v1381_v39 }
 0x256   :  { %v1163_v29 = vsel %vm706_vm4, %v1162_v61, 0.0  ;;  %v1336_v16 = vadd.f32 %v1332_v35, %v2758_v0  ;;  %v1338_v26 = vadd.f32 %v1334_v20, %v2802_v38  ;;  %v1340_v13 = vsel %vm1339_vm5, %v1335_v63, 0.0 }
 0x257   :  { %v1839_v60 = vpop.eup %1838  ;;  %v1343_v14 = vsel %vm1339_vm5, %v1337_v45, 0.0  ;;  %v1395_v47 = vmul.f32 0.005, %v1394_v15  ;;  %v517_v27 = vmul.f32 %v1847_v22, %v1847_v22  ;;  %v544_v57 = vmul.f32 0.005, %v516_v4 }
 0x258   :  { %1113 = vadd.xlane.f32.xlu1 %v1112_v59  ;;  %v1389_v36 = vmul.f32 0.6931472, %v1839_v60  ;;  %v1341_v11 = vsel %vm1339_vm5, %v1336_v16, 0.0  ;;  %v1345_v0 = vsel %vm1339_vm5, %v1338_v26, 0.0  ;;  %v1391_v43 = vmul.f32 0.1, %v1381_v39 }
 0x259   :  { %v1342_v44 = vadd.f32 %v1341_v11, %v1340_v13  ;;  %v518_v24 = vmul.f32 %v1848_v56, %v1848_v56  ;;  %v519_v10 = vmul.f32 %v2582_v41, %v2582_v41  ;;  %v545_v19 = vmul.f32 0.005, %v517_v27 }
 0x25a   :  { %v1390_v38 = vadd.f32 %v1389_v36, %v1382_v28  ;;  %v572_v32 = vadd.f32 %v544_v57, %v3067_v42  ;;  %v1123_v61 = vmul.f32 %v2687_v62, %v2687_v62  ;;  %v1124_v35 = vmul.f32 %v2697_v49, %v2697_v49 }
 0x25b   :  { %v1344_v34 = vadd.f32 %v1343_v14, %v1342_v44  ;;  %v546_v54 = vmul.f32 0.005, %v518_v24  ;;  %v547_v2 = vmul.f32 0.005, %v519_v10  ;;  %v573_v51 = vadd.f32 %v545_v19, %v3068_v52 }
 0x25c   :  { %1164 = vadd.xlane.f32.xlu1 %v1163_v29  ;;  %v1396_v21 = vadd.f32 %v1395_v47, %v1390_v38  ;;  %v1392_v25 = vmul.f32 %v1391_v43, %v1390_v38  ;;  %v603_v50 = vadd.f32 %v2885_v6, %v572_v32  ;;  %v1125_v29 = vmul.f32 %v2712_v3, %v2712_v3 }
 0x25d   :  { %v1346_v40 = vadd.f32 %v1345_v0, %v1344_v34  ;;  %v574_v30 = vadd.f32 %v546_v54, %v3069_v1  ;;  %v575_v59 = vadd.f32 %v547_v2, %v2605_v9  ;;  %v1127_v9 = vsel %vm1105_vm3, %v1123_v61, 0.0 }
 0x25e   :  { %v1398_v12 = vsel %vm1397_vm6, %v1396_v21, 0.0  ;;  %v1393_v17 = vadd.f32 %v1392_v25, %v1379_v46  ;;  %v604_v41 = vadd.f32 %v603_v50, %v573_v51  ;;  %v1128_v16 = vsel %vm1105_vm3, %v1124_v35, 0.0 }
 0x25f   :  { %v606_v60 = vsel %vm581_vm1, %v575_v59, 0.0  ;;  %v718_v49 = vmul.f32 %v2752_v5, %v2752_v5  ;;  %v1129_v45 = vadd.f32 %v1128_v16, %v1127_v9  ;;  %v1126_v26 = vmul.f32 %v2714_v18, %v2714_v18 }
 0x260   :  { %1347 = vadd.xlane.f32.xlu1 %v1346_v40  ;;  %v1426_v8 = vrot.slane %v1393_v17, %v2754_v53  ;;  %v605_v20 = vadd.f32 %v604_v41, %v574_v30  ;;  %v1130_v13 = vsel %vm1105_vm3, %v1125_v29, 0.0  ;;  %v1357_v3 = vmul.f32 %v2772_v58, %v2772_v58 }
 0x261   :  { %v1358_v28 = vmul.f32 %v2774_v55, %v2774_v55  ;;  %v719_v36 = vsel %vm706_vm4, %v718_v49, 0.0  ;;  %v1131_v11 = vadd.f32 %v1130_v13, %v1129_v45  ;;  %v1132_v14 = vsel %vm1105_vm3, %v1126_v26, 0.0 }
 0x262   :  { %v607_v62 = vadd.f32 %v606_v60, %v605_v20  ;;  %v1359_v5 = vmul.f32 %v2812_v33, %v2812_v33  ;;  %v1361_v39 = vsel %vm1339_vm5, %v1357_v3, 0.0  ;;  %v1174_v58 = vmul.f32 %v2833_v48, %v2833_v48 }
 0x263   :  { %v1362_v18 = vsel %vm1339_vm5, %v1358_v28, 0.0  ;;  %v1133_v44 = vadd.f32 %v1132_v14, %v1131_v11  ;;  %v1360_v55 = vmul.f32 %v2814_v7, %v2814_v7  ;;  %v1409_v40 = vmul.f32 %v1393_v17, %v1393_v17 }
 0x264   :  { %1399 = vadd.xlane.f32.xlu1 %v1398_v12  ;;  %v1363_v0 = vadd.f32 %v1362_v18, %v1361_v39  ;;  %v1364_v15 = vsel %vm1339_vm5, %v1359_v5, 0.0  ;;  %v1175_v38 = vsel %vm706_vm4, %v1174_v58, 0.0 }
 0x265   :  { %v1366_v33 = vsel %vm1339_vm5, %v1360_v55, 0.0  ;;  %v1410_v21 = vsel %vm1397_vm6, %v1409_v40, 0.0 }
 0x266   :  { %v1365_v34 = vadd.f32 %v1364_v15, %v1363_v0 }
 0x268   :  { %v1367_v47 = vadd.f32 %v1366_v33, %v1365_v34 }
 0x2dd   :  { %v678_v12 = vpop.xlane.xlu1 %677 }
 0x2de   :  { %v679_v4 = vrot.slane %v678_v12, 4 }
 0x2e0   :  { %v680_v57 = vadd.f32 %v679_v4, %v678_v12 }
 0x2e1   :  { %v709_v48 = vpop.xlane.xlu1 %708 }
 0x2e2   :  { %v710_v7 = vrot.slane %v709_v48, 4  ;;  %v681_v42 = vrot.slane %v680_v57, 2 }
 0x2e4   :  { %v711_v43 = vadd.f32 %v710_v7, %v709_v48  ;;  %v682_v17 = vadd.f32 %v681_v42, %v680_v57 }
 0x2e5   :  { %v1114_v23 = vpop.xlane.xlu1 %1113 }
 0x2e6   :  { %v1115_v27 = vrot.slane %v1114_v23, 4  ;;  %v712_v46 = vrot.slane %v711_v43, 2 }
 0x2e8   :  { %v1116_v10 = vadd.f32 %v1115_v27, %v1114_v23  ;;  %v713_v59 = vadd.f32 %v712_v46, %v711_v43 }
 0x2e9   :  { %v1165_v22 = vpop.xlane.xlu1 %1164 }
 0x2ea   :  { %v1166_v32 = vrot.slane %v1165_v22, 4  ;;  %v1117_v52 = vrot.slane %v1116_v10, 2  ;;  %v714_v9 = vrot.slane %v713_v59, 1 }
 0x2ec   :  { %v1167_v51 = vadd.f32 %v1166_v32, %v1165_v22  ;;  %v1118_v35 = vadd.f32 %v1117_v52, %v1116_v10  ;;  %v715_v5 = vadd.f32 %v714_v9, %v713_v59 }
 0x2ed   :  { %v1348_v19 = vpop.xlane.xlu1 %1347 }
 0x2ee   :  { %v1349_v50 = vrot.slane %v1348_v19, 4  ;;  %v1119_v45 = vrot.slane %v1118_v35, 1 }
 0x2f0   :  { %v1350_v20 = vadd.f32 %v1349_v50, %v1348_v19  ;;  %v1120_v34 = vadd.f32 %v1119_v45, %v1118_v35 }
 0x2f1   :  { %v1400_v30 = vpop.xlane.xlu1 %1399 }
 0x2f2   :  { %v1401_v60 = vrot.slane %v1400_v30, 4  ;;  %v1351_v26 = vrot.slane %v1350_v20, 2 }
 0x2f4   :  { %v1402_v13 = vadd.f32 %v1401_v60, %v1400_v30  ;;  %v1352_v33 = vadd.f32 %v1351_v26, %v1350_v20 }
 0x2f6   :  { %v1403_v15 = vrot.slane %v1402_v13, 2  ;;  %v1353_v22 = vrot.slane %v1352_v33, 1 }
 0x2f8   :  { %v1404_v27 = vadd.f32 %v1403_v15, %v1402_v13  ;;  %v1354_v32 = vadd.f32 %v1353_v22, %v1352_v33 }
 0x31f   :  { %v1497_v31 = vpop.f32.mrb[4].mxu1 }
 0x320   :  { %v1498_v63 = vadd.f32 %v1497_v31, %v1426_v8  ;;  %v1605_v6 = vpop.f32.mrb[5].mxu1  ;;  %v1168_v31 = vrot.slane %v1167_v51, 2 }
 0x322   :  { %v1501_v53 = vsel %vm1339_vm5, %v1498_v63, -inf  ;;  %v1169_v28 = vadd.f32 %v1168_v31, %v1167_v51 }
 0x323   :  { %1502 = vmax.xlane.f32.xlu0 %v1501_v53 }
 0x327   :  { %608 = vadd.xlane.f32.xlu0 %v607_v62 }
 0x32b   :  { %720 = vadd.xlane.f32.xlu0 %v719_v36 }
 0x32f   :  { %1134 = vadd.xlane.f32.xlu0 %v1133_v44 }
 0x333   :  { %1176 = vadd.xlane.f32.xlu0 %v1175_v38  ;;  %v1170_v38 = vrot.slane %v1169_v28, 1 }
 0x335   :  { %v1171_v7 = vadd.f32 %v1170_v38, %v1169_v28 }
 0x337   :  { %1368 = vadd.xlane.f32.xlu0 %v1367_v47 }
 0x33b   :  { %1411 = vadd.xlane.f32.xlu0 %v1410_v21 }
 0x3b0   :  { %v1503_v56 = vpop.xlane.xlu0 %1502 }
 0x3b1   :  { %v1504_v24 = vsub.f32 %v1498_v63, %v1503_v56  ;;  %v683_v63 = vrot.slane %v682_v17, 1 }
 0x3b3   :  { %v1505_v25 = vmul.f32 1.442695, %v1504_v24  ;;  %v684_v3 = vadd.f32 %v683_v63, %v682_v17 }
 0x3b4   :  { %v609_v54 = vpop.xlane.xlu0 %608 }
 0x3b5   :  { %1840 = vpow2.f32 %v1505_v25  ;;  %v610_v2 = vrot.slane %v609_v54, 4  ;;  %v1405_v25 = vrot.slane %v1404_v27, 1 }
 0x3b7   :  { %v611_v1 = vadd.f32 %v610_v2, %v609_v54  ;;  %v1406_v50 = vadd.f32 %v1405_v25, %v1404_v27 }
 0x3b8   :  { %v721_v41 = vpop.xlane.xlu0 %720 }
 0x3b9   :  { %v612_v8 = vrot.slane %v611_v1, 2  ;;  %v722_v61 = vrot.slane %v721_v41, 4 }
 0x3bb   :  { %v723_v6 = vadd.f32 %v722_v61, %v721_v41  ;;  %v613_v29 = vadd.f32 %v612_v8, %v611_v1  ;;  %v1525_v41 = vand.u32 127, %v732_v37 }
 0x3bc   :  { %v1135_v16 = vpop.xlane.xlu0 %1134 }
 0x3bd   :  { %v724_v53 = vrot.slane %v723_v6, 2  ;;  %v1136_v62 = vrot.slane %v1135_v16, 4  ;;  %v614_v49 = vrot.slane %v613_v29, 1  ;;  %vm1527_vm7 = vcmp.eq.s32.totalorder %v1525_v41, 1 }
 0x3be   :  { %vm1526_vm8 = vcmp.eq.s32.totalorder %v1525_v41, 0 }
 0x3bf   :  { %v2971_v36 = vpop.eup %1840  ;;  %v1137_v11 = vadd.f32 %v1136_v62, %v1135_v16  ;;  %v615_v14 = vadd.f32 %v614_v49, %v613_v29  ;;  %v725_v39 = vadd.f32 %v724_v53, %v723_v6 }
 0x3c0   :  { %v1507_v18 = vsel %vm1339_vm5, %v2971_v36, 0.0  ;;  %v1177_v44 = vpop.xlane.xlu0 %1176 }
 0x3c1   :  { %1508 = vadd.xlane.f32.xlu1 %v1507_v18  ;;  %v1138_v0 = vrot.slane %v1137_v11, 2  ;;  %v1178_v58 = vrot.slane %v1177_v44, 4  ;;  %1656 = vpush %v615_v14  ;;  %v726_v55 = vrot.slane %v725_v39, 1 }
 0x3c2   :  { %1658 = vpush %v684_v3 }
 0x3c3   :  { %v1179_v47 = vadd.f32 %v1178_v58, %v1177_v44  ;;  %1660 = vpush %v715_v5  ;;  %v727_v40 = vadd.f32 %v726_v55, %v725_v39  ;;  %v1139_v21 = vadd.f32 %v1138_v0, %v1137_v11 }
 0x3c4   :  { %v1369_v12 = vpop.xlane.xlu0 %1368 }
 0x3c5   :  { %v1180_v48 = vrot.slane %v1179_v47, 2  ;;  %v1370_v23 = vrot.slane %v1369_v12, 4  ;;  %1662 = vpush %v727_v40  ;;  %v1140_v4 = vrot.slane %v1139_v21, 1 }
 0x3c6   :  { %1664 = vpush %v1120_v34 }
 0x3c7   :  { %v1371_v57 = vadd.f32 %v1370_v23, %v1369_v12  ;;  %v1141_v43 = vadd.f32 %v1140_v4, %v1139_v21  ;;  %v1181_v56 = vadd.f32 %v1180_v48, %v1179_v47 }
 0x3c8   :  { %v1412_v24 = vpop.xlane.xlu0 %1411 }
 0x3c9   :  { %v1372_v10 = vrot.slane %v1371_v57, 2  ;;  %v1413_v19 = vrot.slane %v1412_v24, 4  ;;  %1666 = vpush %v1141_v43  ;;  %v1182_v42 = vrot.slane %v1181_v56, 1 }
 0x3ca   :  { %1668 = vpush %v1171_v7 }
 0x3cb   :  { %v1414_v46 = vadd.f32 %v1413_v19, %v1412_v24  ;;  %v1183_v54 = vadd.f32 %v1182_v42, %v1181_v56  ;;  %v1373_v2 = vadd.f32 %v1372_v10, %v1371_v57 }
 0x3cd   :  { %v1415_v52 = vrot.slane %v1414_v46, 2  ;;  %1670 = vpush %v1183_v54  ;;  %v1374_v51 = vrot.slane %v1373_v2, 1 }
 0x3ce   :  { %1672 = vpush %v1354_v32 }
 0x3cf   :  { %v1416_v17 = vadd.f32 %v1415_v52, %v1414_v46  ;;  %v1375_v1 = vadd.f32 %v1374_v51, %v1373_v2 }
 0x3d1   :  { %1674 = vpush %v1375_v1  ;;  %v1417_v30 = vrot.slane %v1416_v17, 1 }
 0x3d2   :  { %1676 = vpush %v1406_v50 }
 0x3d3   :  { %v1418_v59 = vadd.f32 %v1417_v30, %v1416_v17 }
 0x3d5   :  { %1678 = vpush %v1418_v59 }
 0x3f2   :  { %s1657_s11 = spop %1656 }
 0x3f3   :  { %s617_s13 = ssub.f32 -23054.33, %s1657_s11  ;;  %s1659_s24 = spop %1658 }
 0x3f4   :  { %s686_s4 = smul.f32 50.0, %s1659_s24  ;;  %s1661_s2 = spop %1660 }
 0x3f5   :  { %s717_s23 = ssub.f32 -29.406033, %s1661_s2 }
 0x3f6   :  { %s1663_s25 = spop %1662  ;;  %s687_s3 = ssub.f32 34712.926, %s686_s4 }
 0x3f7   :  { %s729_s27 = smul.f32 50.0, %s1663_s25  ;;  %s1514_s17 = sadd.f32 %s717_s23, %s617_s13 }
 0x3f8   :  { %s1665_s14 = spop %1664 }
 0x3f9   :  { %s730_s9 = ssub.f32 44.27669, %s729_s27 }
 0x3fa   :  { %s1122_s28 = ssub.f32 -940.99304, %s1665_s14  ;;  %s1667_s8 = spop %1666 }
 0x3fb   :  { %s1519_s26 = sadd.f32 %s730_s9, %s687_s3  ;;  %s1143_s16 = smul.f32 50.0, %s1667_s8 }
 0x3fc   :  { %s1515_s29 = sadd.f32 %s1514_s17, %s1122_s28  ;;  %s1669_s7 = spop %1668 }
 0x3fd   :  { %s1144_s30 = ssub.f32 1416.8541, %s1143_s16  ;;  %s1876_s8 = smov [#allocation2]  }
 0x3fe   :  { %s1173_s12 = ssub.f32 -29.406033, %s1669_s7  ;;  %s1671_s15 = spop %1670 }
 0x3ff   :  { %s1520_s0 = sadd.f32 %s1519_s26, %s1144_s30  ;;  %s1185_s21 = smul.f32 50.0, %s1671_s15 }
 0x400   :  { %s1516_s18 = sadd.f32 %s1515_s29, %s1173_s12  ;;  %s1673_s6 = spop %1672 }
 0x401   :  { %s1186_s1 = ssub.f32 44.27669, %s1185_s21  ;;  %s1539_s26 = sshll.u32 %s1876_s8, 4  ;;  %s1540_s26 = int_to_ptr.vmem [resolvable:$true] %s1539_s26 }
 0x402   :  { %s1356_s5 = ssub.f32 -294.06033, %s1673_s6  ;;  %s1675_s22 = spop %1674 }
 0x403   :  { %s1521_s10 = sadd.f32 %s1520_s0, %s1186_s1  ;;  %s1377_s11 = smul.f32 50.0, %s1675_s22 }
 0x404   :  { %s1517_s13 = sadd.f32 %s1516_s18, %s1356_s5  ;;  %s1677_s24 = spop %1676 }
 0x405   :  { %s1378_s4 = ssub.f32 442.7669, %s1377_s11  ;;  %s1849_s16 = scalar_lea.vmem %s1540_s26, 128 }
 0x406   :  { %s1408_s2 = ssub.f32 -9.189385, %s1677_s24  ;;  %s1679_s23 = spop %1678 }
 0x407   :  { %s1522_s25 = sadd.f32 %s1521_s10, %s1378_s4  ;;  %s1420_s3 = smul.f32 50.0, %s1679_s23 }
 0x408   :  { %s1518_s27 = sadd.f32 %s1517_s13, %s1408_s2  ;;  %p1850_p0 = scmp.ne.s32.totalorder %s1540_s26, %s1849_s16 }
 0x409   :  { %s1421_s17 = ssub.f32 13.836466, %s1420_s3  ;;  %p1854_p1 = scmp.lt.s32.totalorder %s1540_s26, %s1540_s26 }
 0x40a   :  { %v1530_v8 = vstv %s1518_s27  ;;  %p1855_p2 = scmp.lt.s32.totalorder %s1849_s16, %s1849_s16 }
 0x40b   :  { %s1523_s14 = sadd.f32 %s1522_s25, %s1421_s17 }
 0x40c   :  { %p1856_p3 = por %p1855_p2, %p1854_p1 }
 0x40d   :  { %v1528_v61 = vstv %s1523_s14 }
 0x40e   :  { %v1529_v35 = vsel %vm1527_vm7, %v1528_v61, 0.0  ;;  %p1857_p4 = pnand %p1856_p3, %p1850_p0 }
 0x40f   :  { %v1531_v31 = vsel %vm1526_vm8, %v1530_v8, %v1529_v35 }
 0x410   :  { %1532 = vst [vmem:[%s3013_s20] sm:$0x1] %v1531_v31 }
 0x44e   :  { %v1509_v20 = vpop.xlane.xlu1 %1508 }
 0x44f   :  { %1842 = vrcp.f32 %v1509_v20 }
 0x459   :  { %v1843_v60 = vpop.eup %1842 }
 0x45a   :  { %v1511_v37 = vmul.f32 %v1843_v60, %v2971_v36 }
 0x45c   :  { %1513 = vst.msk [vmem:[#allocation2] sm:$0xff] %vm1339_vm5, %v1511_v37 }
 0x45d   :  { %1860 = shalt.err (!%p1857_p4)
}
 0x45e   :  { %s1861_s20 = scalar_lea.hbm %s3012_s19, 128 }
 0x45f   :  { %p1862_p5 = scmp.ne.s32.totalorder %s3012_s19, %s1861_s20  ;;  %p1865_p6 = scmp.lt.u32.totalorder %s1861_s20, %s3012_s19 }
 0x461   :  { %p1867_p7 = pnand %p1865_p6, %p1862_p5 }
 0x463   :  { %1870 = shalt.err (!%p1867_p7)
}
 0x464   :  { %1542 = dma.vmem_to_hbm [thread:$0]  %s1540_s26, 128, %s3012_s19, [#allocation3]  }
 0x465   :  { %1871 = dma.done.wait [#allocation3], 128  }
 0x466   :  { %1872 = vsyncadd [#allocation3], 4294967168 }
 0x467   :  { %1550 = vsyncpa [#allocation3], 1 }

</bundles_post_ra>
